<compile_context>
chip_gen: v5e
topology: v5e:2x2
jax: 0.10.0
libtpu: 0.0.40
codegen_flags: <defaults>
</compile_context>

<pallas_src>
import functools
import math

import jax
import jax.numpy as jnp
from jax import lax
from jax.experimental import pallas as pl
from jax.experimental.pallas import tpu as pltpu


def _mm_t(x, w):
    """x:(M,K) @ w:(N,K)^T -> (M,N) f32. bf16 MXU inputs, f32 accumulation,
    trans_b form (no explicit transpose)."""
    return lax.dot_general(
        x.astype(jnp.bfloat16), w.astype(jnp.bfloat16),
        dimension_numbers=(((1,), (1,)), ((), ())),
        preferred_element_type=jnp.float32)


def _layer_norm(x, gamma, beta, eps):
    mean = jnp.mean(x, axis=-1, keepdims=True)
    var = jnp.mean(jnp.square(x - mean), axis=-1, keepdims=True)
    return (x - mean) * lax.rsqrt(var + eps) * gamma + beta


def _fused_kernel(
    x_ref,                        # (Bt, S, Fin)        f32
    wip_ref, bip_ref,             # (H, Fin) bf16, (1, H) f32     input proj
    wop_ref, bop_ref,             # (OutPad, H) bf16, (1, OutPad) f32  output proj
    w_in_ref, b_in_ref,           # (3H, H) bf16, (1, 3H) f32     qkv proj (layer l)
    w_o_ref, b_o_ref,             # (H, H) bf16, (1, H) f32       attn out proj
    g1_ref, be1_ref,              # (1, H) f32                    norm1
    w1_ref, bf1_ref,              # (F, H) bf16, (1, F) f32       linear1
    w2_ref, bf2_ref,              # (H, F) bf16, (1, H) f32       linear2
    g2_ref, be2_ref,              # (1, H) f32                    norm2
    o_ref,                        # (Bt, S, OutPad)     f32
    h_scr,                        # (Bt*S, H) f32 — persists across layer steps
    *, nhead, eps,
):
    layer = pl.program_id(1)
    Bt, S, Fin = x_ref.shape
    H = w_o_ref.shape[0]
    dk = H // nhead
    M = Bt * S
    scale = 1.0 / math.sqrt(dk)

    # ---- layer 0: fused input projection; activation stays resident in VMEM
    @pl.when(layer == 0)
    def _():
        h_scr[...] = _mm_t(x_ref[...].reshape(M, Fin), wip_ref[...]) + bip_ref[...]

    h = h_scr[...]                                           # (M, H) f32

    # ---- multi-head self-attention (eval mode: dropout = identity) --------
    qkv = _mm_t(h, w_in_ref[...]) + b_in_ref[...]            # (M, 3H) f32

    # Per-head lane slices gathered once; heads are folded into the leading
    # batch dimension (order = (head, batch)) so the score and p.V matmuls
    # are each a single batched MXU call instead of an nhead unroll.
    q_l, k_l, v_l = [], [], []
    for hd in range(nhead):
        qs = slice(hd * dk, (hd + 1) * dk)
        ks = slice(H + hd * dk, H + (hd + 1) * dk)
        vs = slice(2 * H + hd * dk, 2 * H + (hd + 1) * dk)
        # fold 1/sqrt(dk) into the Q cast (cheaper than scaling the scores)
        q_l.append((qkv[:, qs] * scale).astype(jnp.bfloat16).reshape(Bt, S, dk))
        k_l.append(qkv[:, ks].astype(jnp.bfloat16).reshape(Bt, S, dk))
        v_l.append(qkv[:, vs].astype(jnp.bfloat16).reshape(Bt, S, dk))
    q = jnp.concatenate(q_l, axis=0)                         # (nhead*Bt, S, dk)
    k = jnp.concatenate(k_l, axis=0)
    v = jnp.concatenate(v_l, axis=0)

    sc = jnp.einsum("bsd,btd->bst", q, k,
                    preferred_element_type=jnp.float32)      # (nhead*Bt, S, S)
    sc = sc - jnp.max(sc, axis=-1, keepdims=True)
    p = jnp.exp(sc)
    # approx reciprocal on the EUP: rows sum to 1 only to ~1e-3 rel (documented)
    p = p * pl.reciprocal(jnp.sum(p, axis=-1, keepdims=True), approx=True)
    ctx = jnp.einsum("bst,btd->bsd", p.astype(jnp.bfloat16), v,
                     preferred_element_type=jnp.float32)     # (nhead*Bt, S, dk)

    # Merge heads back to (M, H) lane order (h*dk + d) and do ONE K = H
    # out-projection matmul (full MXU contraction depth).
    ctx_heads = [
        ctx[hd * Bt:(hd + 1) * Bt].reshape(M, dk).astype(jnp.bfloat16)
        for hd in range(nhead)
    ]
    ctx_mh = jnp.concatenate(ctx_heads, axis=-1)             # (M, H) bf16
    attn = _mm_t(ctx_mh, w_o_ref[...]) + b_o_ref[...]        # (M, H) f32

    h1 = _layer_norm(h + attn, g1_ref[...], be1_ref[...], eps)

    # ---- feed-forward: linear -> ReLU -> linear (hidden kept in bf16) ------
    hdn = jnp.maximum(_mm_t(h1, w1_ref[...]) + bf1_ref[...], 0.0
                      ).astype(jnp.bfloat16)                 # (M, F) bf16
    ff = _mm_t(hdn, w2_ref[...]) + bf2_ref[...]
    h2 = _layer_norm(h1 + ff, g2_ref[...], be2_ref[...], eps)

    h_scr[...] = h2

    # ---- last layer: fused, lane-padded (x128) output projection -----------
    @pl.when(layer == pl.num_programs(1) - 1)
    def _():
        out = _mm_t(h2, wop_ref[...]) + bop_ref[...]         # (M, OutPad)
        o_ref[...] = out.reshape(Bt, S, -1)


def _pick_vmem_limit():
    """Per-generation VMEM budget: ~56 MiB on v7x (64 MiB phys), ~100 MiB on
    v5e/v6e (128 MiB phys).  Falls back to 64 MiB if the query fails."""
    try:
        info = pltpu.get_tpu_info()
        cap = getattr(info, "vmem_capacity_bytes", None)
        if cap:
            return int(min(cap - 8 * 1024 * 1024, 100 * 1024 * 1024))
    except Exception:
        pass
    return 64 * 1024 * 1024


def _ffn_weight_spec(block_shape, index_map, single_buffer):
    """Optionally drop to single buffering for very large FFN weights (v7x)."""
    if single_buffer:
        try:
            return pl.BlockSpec(block_shape, index_map,
                                pipeline_mode=pl.Buffered(1))
        except TypeError:
            pass  # older jax: fall back to default double buffering
    return pl.BlockSpec(block_shape, index_map)


class TransformerBlockPallas:
    def __init__(self, in_features, out_features, num_layers, hidden_features,
                 nhead=4, dim_feedforward=2048, layer_norm_eps=1e-5,
                 key=jax.random.PRNGKey(42)):
        assert hidden_features % nhead == 0
        self.nhead = nhead
        self.eps = float(layer_norm_eps)
        self.num_layers = num_layers
        self.in_features = in_features
        self.out_features = out_features
        self.hidden = hidden_features
        self.ffn = dim_feedforward
        H, F, L = hidden_features, dim_feedforward, num_layers
        # NOTE: for best MXU/lane utilization choose H, dk as multiples of 128.

        def w(k, shape):
            return (0.02 * jax.random.normal(k, shape)).astype(jnp.float32)

        keys = jax.random.split(key, 2 + 4 * num_layers)
        ki = iter(keys)

        # input / output projections (matmul weights bf16, biases f32)
        self.w_in_proj = w(next(ki), (H, in_features)).astype(jnp.bfloat16)
        self.b_in_proj = jnp.zeros((1, H), jnp.float32)
        self.out_pad = ((out_features + 127) // 128) * 128   # lane-dense output
        w_out = w(next(ki), (out_features, H))
        self.w_out_proj = (jnp.zeros((self.out_pad, H), jnp.float32)
                           .at[:out_features].set(w_out).astype(jnp.bfloat16))
        self.b_out_proj = jnp.zeros((1, self.out_pad), jnp.float32)

        # per-layer encoder params, stacked along a leading layer axis
        w_in_l, w_o_l, w1_l, w2_l = [], [], [], []
        for _ in range(num_layers):
            w_in_l.append(w(next(ki), (3 * H, H)))   # qkv in_proj
            w_o_l.append(w(next(ki), (H, H)))        # attn out_proj
            w1_l.append(w(next(ki), (F, H)))         # linear1
            w2_l.append(w(next(ki), (H, F)))         # linear2

        self.w_in = jnp.stack(w_in_l).astype(jnp.bfloat16)    # (L, 3H, H)
        self.b_in = jnp.zeros((L, 1, 3 * H), jnp.float32)
        self.w_o = jnp.stack(w_o_l).astype(jnp.bfloat16)      # (L, H, H)
        self.b_o = jnp.zeros((L, 1, H), jnp.float32)
        self.g1 = jnp.ones((L, 1, H), jnp.float32)
        self.be1 = jnp.zeros((L, 1, H), jnp.float32)
        self.w1 = jnp.stack(w1_l).astype(jnp.bfloat16)        # (L, F, H)
        self.bf1 = jnp.zeros((L, 1, F), jnp.float32)
        self.w2 = jnp.stack(w2_l).astype(jnp.bfloat16)        # (L, H, F)
        self.bf2 = jnp.zeros((L, 1, H), jnp.float32)
        self.g2 = jnp.ones((L, 1, H), jnp.float32)
        self.be2 = jnp.zeros((L, 1, H), jnp.float32)

    def __call__(self, x):
        # x: (S, B, in_features), seq-first like PyTorch batch_first=False
        S, B, Fin = x.shape
        H, F, L = self.hidden, self.ffn, self.num_layers
        OUTP = self.out_pad

        # >=2 batch tiles when possible so the "parallel" axis feeds both v7x
        # TensorCores; a single tile otherwise.
        bB = B // 2 if (B % 2 == 0 and B >= 2) else B

        vmem_limit = _pick_vmem_limit()
        # double-buffered bf16 FFN weights cost 8*F*H bytes; if that would eat
        # too much of the budget, drop them to single buffering.
        single_buf_ffn = (8 * F * H) > (vmem_limit // 2)

        xb = jnp.transpose(x, (1, 0, 2))         # one tiny host permute of input

        kern = functools.partial(_fused_kernel, nhead=self.nhead, eps=self.eps)

        def fixed2(bt, l): return (0, 0)
        def fixed_x(bt, l): return (bt, 0, 0)
        def per_layer(bt, l): return (l, 0, 0)

        out = pl.pallas_call(
            kern,
            out_shape=jax.ShapeDtypeStruct((B, S, OUTP), jnp.float32),
            grid_spec=pltpu.PrefetchScalarGridSpec(
                num_scalar_prefetch=0,
                grid=(B // bB, L),               # (batch tiles, layers)
                in_specs=[
                    pl.BlockSpec((bB, S, Fin), fixed_x),        # x
                    pl.BlockSpec((H, Fin), fixed2),             # w_in_proj
                    pl.BlockSpec((1, H), fixed2),               # b_in_proj
                    pl.BlockSpec((OUTP, H), fixed2),            # w_out_proj (padded)
                    pl.BlockSpec((1, OUTP), fixed2),            # b_out_proj (padded)
                    pl.BlockSpec((None, 3 * H, H), per_layer),  # w_in  (layer l)
                    pl.BlockSpec((None, 1, 3 * H), per_layer),  # b_in
                    pl.BlockSpec((None, H, H), per_layer),      # w_o
                    pl.BlockSpec((None, 1, H), per_layer),      # b_o
                    pl.BlockSpec((None, 1, H), per_layer),      # g1
                    pl.BlockSpec((None, 1, H), per_layer),      # be1
                    _ffn_weight_spec((None, F, H), per_layer, single_buf_ffn),  # w1
                    pl.BlockSpec((None, 1, F), per_layer),      # bf1
                    _ffn_weight_spec((None, H, F), per_layer, single_buf_ffn),  # w2
                    pl.BlockSpec((None, 1, H), per_layer),      # bf2
                    pl.BlockSpec((None, 1, H), per_layer),      # g2
                    pl.BlockSpec((None, 1, H), per_layer),      # be2
                ],
                out_specs=pl.BlockSpec((bB, S, OUTP), fixed_x),
                scratch_shapes=[pltpu.VMEM((bB * S, H), jnp.float32)],
            ),
            compiler_params=pltpu.CompilerParams(
                dimension_semantics=("parallel", "arbitrary"),
                vmem_limit_bytes=vmem_limit),
        )(xb, self.w_in_proj, self.b_in_proj, self.w_out_proj, self.b_out_proj,
          self.w_in, self.b_in, self.w_o, self.b_o, self.g1, self.be1,
          self.w1, self.bf1, self.w2, self.bf2, self.g2, self.be2)

        out = jnp.transpose(out, (1, 0, 2))[..., : self.out_features]  # (S, B, out)
        # mimic torch's x.squeeze(0): drops dim 0 only if it has size 1
        if out.shape[0] == 1:
            out = out[0]
        return out


if __name__ == "__main__":
    in_features, out_features = 16, 8
    num_layers, hidden_features, nhead = 2, 32, 4
    S, B = 8, 2  # seq-first input (S, B, in_features)

    model = TransformerBlockPallas(
        in_features, out_features, num_layers, hidden_features, nhead=nhead
    )

    x = jax.random.normal(
        jax.random.PRNGKey(0), (S, B, in_features), dtype=jnp.float32
    )

    out = model(x)
    jax.block_until_ready(out)
    assert out.shape == (S, B, out_features), out.shape
    assert bool(jnp.all(jnp.isfinite(out)))
    print("KERNEL_OK")
</pallas_src>

<mosaic_0001>
module attributes {stable_mosaic.version = 11 : i64} {
  func.func @_fused_kernel(%arg0: i32, %arg1: i32, %arg2: memref<1x8x16xf32, #tpu.memory_space<vmem>>, %arg3: memref<32x16xbf16, #tpu.memory_space<vmem>>, %arg4: memref<1x32xf32, #tpu.memory_space<vmem>>, %arg5: memref<128x32xbf16, #tpu.memory_space<vmem>>, %arg6: memref<1x128xf32, #tpu.memory_space<vmem>>, %arg7: memref<1x96x32xbf16, #tpu.memory_space<vmem>>, %arg8: memref<1x1x96xf32, #tpu.memory_space<vmem>>, %arg9: memref<1x32x32xbf16, #tpu.memory_space<vmem>>, %arg10: memref<1x1x32xf32, #tpu.memory_space<vmem>>, %arg11: memref<1x1x32xf32, #tpu.memory_space<vmem>>, %arg12: memref<1x1x32xf32, #tpu.memory_space<vmem>>, %arg13: memref<1x2048x32xbf16, #tpu.memory_space<vmem>>, %arg14: memref<1x1x2048xf32, #tpu.memory_space<vmem>>, %arg15: memref<1x32x2048xbf16, #tpu.memory_space<vmem>>, %arg16: memref<1x1x32xf32, #tpu.memory_space<vmem>>, %arg17: memref<1x1x32xf32, #tpu.memory_space<vmem>>, %arg18: memref<1x1x32xf32, #tpu.memory_space<vmem>>, %arg19: memref<1x8x128xf32, #tpu.memory_space<vmem>>, %arg20: memref<8x32xf32, #tpu.memory_space<vmem>>) attributes {dimension_semantics = [#tpu.dimension_semantics<parallel>, #tpu.dimension_semantics<arbitrary>], iteration_bounds = array<i64: 2, 2>, scalar_prefetch = 0 : i64, scratch_operands = 1 : i64, tpu.core_type = #tpu.core_type<tc>, window_params = [{transform_indices = @transform_0, window_bounds = array<i64: 1, 8, 16>}, {pipeline_mode = #tpu.pipeline_mode<synchronous>, transform_indices = @transform_1, window_bounds = array<i64: 32, 16>}, {pipeline_mode = #tpu.pipeline_mode<synchronous>, transform_indices = @transform_2, window_bounds = array<i64: 1, 32>}, {pipeline_mode = #tpu.pipeline_mode<synchronous>, transform_indices = @transform_3, window_bounds = array<i64: 128, 32>}, {pipeline_mode = #tpu.pipeline_mode<synchronous>, transform_indices = @transform_4, window_bounds = array<i64: 1, 128>}, {transform_indices = @transform_5, window_bounds = array<i64: 1, 96, 32>}, {transform_indices = @transform_6, window_bounds = array<i64: 1, 1, 96>}, {transform_indices = @transform_7, window_bounds = array<i64: 1, 32, 32>}, {transform_indices = @transform_8, window_bounds = array<i64: 1, 1, 32>}, {transform_indices = @transform_9, window_bounds = array<i64: 1, 1, 32>}, {transform_indices = @transform_10, window_bounds = array<i64: 1, 1, 32>}, {transform_indices = @transform_11, window_bounds = array<i64: 1, 2048, 32>}, {transform_indices = @transform_12, window_bounds = array<i64: 1, 1, 2048>}, {transform_indices = @transform_13, window_bounds = array<i64: 1, 32, 2048>}, {transform_indices = @transform_14, window_bounds = array<i64: 1, 1, 32>}, {transform_indices = @transform_15, window_bounds = array<i64: 1, 1, 32>}, {transform_indices = @transform_16, window_bounds = array<i64: 1, 1, 32>}, {transform_indices = @transform_17, window_bounds = array<i64: 1, 8, 128>}]} {
    %c0_i32 = arith.constant 0 : i32
    %0 = arith.cmpi eq, %arg1, %c0_i32 : i32
    %1 = arith.extui %0 : i1 to i32
    %c0_i32_0 = arith.constant 0 : i32
    %2 = arith.cmpi ne, %1, %c0_i32_0 : i32
    scf.if %2 {
      %c0_63 = arith.constant 0 : index
      %c0_64 = arith.constant 0 : index
      %c0_65 = arith.constant 0 : index
      %168 = vector.load %arg2[%c0_63, %c0_64, %c0_65] : memref<1x8x16xf32, #tpu.memory_space<vmem>>, vector<1x8x16xf32>
      %169 = vector.shape_cast %168 : vector<1x8x16xf32> to vector<8x16xf32>
      %c0_66 = arith.constant 0 : index
      %c0_67 = arith.constant 0 : index
      %170 = vector.load %arg3[%c0_66, %c0_67] : memref<32x16xbf16, #tpu.memory_space<vmem>>, vector<32x16xbf16>
      %171 = arith.truncf %169 : vector<8x16xf32> to vector<8x16xbf16>
      %cst_68 = arith.constant dense<0.000000e+00> : vector<8x32xf32>
      %172 = tpu.matmul %171, %170, %cst_68 {dimension_numbers = #tpu.dot_dimension_numbers<[1], [1], [0], [0], [0, 0, 1, 0], [], []>} : vector<8x16xbf16>, vector<32x16xbf16>, vector<8x32xf32> -> vector<8x32xf32>
      %c0_69 = arith.constant 0 : index
      %c0_70 = arith.constant 0 : index
      %173 = vector.load %arg4[%c0_69, %c0_70] : memref<1x32xf32, #tpu.memory_space<vmem>>, vector<1x32xf32>
      %174 = vector.broadcast %173 : vector<1x32xf32> to vector<8x32xf32>
      %175 = arith.addf %172, %174 : vector<8x32xf32>
      %c0_71 = arith.constant 0 : index
      %c0_72 = arith.constant 0 : index
      %176 = vector.load %arg20[%c0_71, %c0_72] : memref<8x32xf32, #tpu.memory_space<vmem>>, vector<8x32xf32>
      tpu.vector_store %arg20[%c0_71, %c0_72], %175 {strides = array<i32>} : memref<8x32xf32, #tpu.memory_space<vmem>>, vector<8x32xf32>,
    } else {
    }
    %c0 = arith.constant 0 : index
    %c0_1 = arith.constant 0 : index
    %3 = vector.load %arg20[%c0, %c0_1] : memref<8x32xf32, #tpu.memory_space<vmem>>, vector<8x32xf32>
    %c0_2 = arith.constant 0 : index
    %c0_3 = arith.constant 0 : index
    %c0_4 = arith.constant 0 : index
    %4 = vector.load %arg7[%c0_2, %c0_3, %c0_4] : memref<1x96x32xbf16, #tpu.memory_space<vmem>>, vector<1x96x32xbf16>
    %5 = vector.shape_cast %4 : vector<1x96x32xbf16> to vector<96x32xbf16>
    %6 = arith.truncf %3 : vector<8x32xf32> to vector<8x32xbf16>
    %cst = arith.constant dense<0.000000e+00> : vector<8x96xf32>
    %7 = tpu.matmul %6, %5, %cst {dimension_numbers = #tpu.dot_dimension_numbers<[1], [1], [0], [0], [0, 0, 1, 0], [], []>} : vector<8x32xbf16>, vector<96x32xbf16>, vector<8x96xf32> -> vector<8x96xf32>
    %c0_5 = arith.constant 0 : index
    %c0_6 = arith.constant 0 : index
    %c0_7 = arith.constant 0 : index
    %8 = vector.load %arg8[%c0_5, %c0_6, %c0_7] : memref<1x1x96xf32, #tpu.memory_space<vmem>>, vector<1x1x96xf32>
    %9 = vector.shape_cast %8 : vector<1x1x96xf32> to vector<1x96xf32>
    %10 = vector.broadcast %9 : vector<1x96xf32> to vector<8x96xf32>
    %11 = arith.addf %7, %10 : vector<8x96xf32>
    %12 = vector.extract_strided_slice %11 {offsets = [0, 0], sizes = [8, 8], strides = [1, 1]} : vector<8x96xf32> to vector<8x8xf32>
    %cst_8 = arith.constant 0.353553385 : f32
    %13 = vector.broadcast %cst_8 : f32 to vector<8x8xf32>
    %14 = arith.mulf %12, %13 : vector<8x8xf32>
    %15 = arith.truncf %14 : vector<8x8xf32> to vector<8x8xbf16>
    %16 = vector.shape_cast %15 : vector<8x8xbf16> to vector<1x8x8xbf16>
    %17 = vector.extract_strided_slice %11 {offsets = [0, 32], sizes = [8, 8], strides = [1, 1]} : vector<8x96xf32> to vector<8x8xf32>
    %18 = arith.truncf %17 : vector<8x8xf32> to vector<8x8xbf16>
    %19 = vector.shape_cast %18 : vector<8x8xbf16> to vector<1x8x8xbf16>
    %20 = vector.extract_strided_slice %11 {offsets = [0, 64], sizes = [8, 8], strides = [1, 1]} : vector<8x96xf32> to vector<8x8xf32>
    %21 = arith.truncf %20 : vector<8x8xf32> to vector<8x8xbf16>
    %22 = vector.shape_cast %21 : vector<8x8xbf16> to vector<1x8x8xbf16>
    %23 = vector.extract_strided_slice %11 {offsets = [0, 8], sizes = [8, 8], strides = [1, 1]} : vector<8x96xf32> to vector<8x8xf32>
    %cst_9 = arith.constant 0.353553385 : f32
    %24 = vector.broadcast %cst_9 : f32 to vector<8x8xf32>
    %25 = arith.mulf %23, %24 : vector<8x8xf32>
    %26 = arith.truncf %25 : vector<8x8xf32> to vector<8x8xbf16>
    %27 = vector.shape_cast %26 : vector<8x8xbf16> to vector<1x8x8xbf16>
    %28 = vector.extract_strided_slice %11 {offsets = [0, 40], sizes = [8, 8], strides = [1, 1]} : vector<8x96xf32> to vector<8x8xf32>
    %29 = arith.truncf %28 : vector<8x8xf32> to vector<8x8xbf16>
    %30 = vector.shape_cast %29 : vector<8x8xbf16> to vector<1x8x8xbf16>
    %31 = vector.extract_strided_slice %11 {offsets = [0, 72], sizes = [8, 8], strides = [1, 1]} : vector<8x96xf32> to vector<8x8xf32>
    %32 = arith.truncf %31 : vector<8x8xf32> to vector<8x8xbf16>
    %33 = vector.shape_cast %32 : vector<8x8xbf16> to vector<1x8x8xbf16>
    %34 = vector.extract_strided_slice %11 {offsets = [0, 16], sizes = [8, 8], strides = [1, 1]} : vector<8x96xf32> to vector<8x8xf32>
    %cst_10 = arith.constant 0.353553385 : f32
    %35 = vector.broadcast %cst_10 : f32 to vector<8x8xf32>
    %36 = arith.mulf %34, %35 : vector<8x8xf32>
    %37 = arith.truncf %36 : vector<8x8xf32> to vector<8x8xbf16>
    %38 = vector.shape_cast %37 : vector<8x8xbf16> to vector<1x8x8xbf16>
    %39 = vector.extract_strided_slice %11 {offsets = [0, 48], sizes = [8, 8], strides = [1, 1]} : vector<8x96xf32> to vector<8x8xf32>
    %40 = arith.truncf %39 : vector<8x8xf32> to vector<8x8xbf16>
    %41 = vector.shape_cast %40 : vector<8x8xbf16> to vector<1x8x8xbf16>
    %42 = vector.extract_strided_slice %11 {offsets = [0, 80], sizes = [8, 8], strides = [1, 1]} : vector<8x96xf32> to vector<8x8xf32>
    %43 = arith.truncf %42 : vector<8x8xf32> to vector<8x8xbf16>
    %44 = vector.shape_cast %43 : vector<8x8xbf16> to vector<1x8x8xbf16>
    %45 = vector.extract_strided_slice %11 {offsets = [0, 24], sizes = [8, 8], strides = [1, 1]} : vector<8x96xf32> to vector<8x8xf32>
    %cst_11 = arith.constant 0.353553385 : f32
    %46 = vector.broadcast %cst_11 : f32 to vector<8x8xf32>
    %47 = arith.mulf %45, %46 : vector<8x8xf32>
    %48 = arith.truncf %47 : vector<8x8xf32> to vector<8x8xbf16>
    %49 = vector.shape_cast %48 : vector<8x8xbf16> to vector<1x8x8xbf16>
    %50 = vector.extract_strided_slice %11 {offsets = [0, 56], sizes = [8, 8], strides = [1, 1]} : vector<8x96xf32> to vector<8x8xf32>
    %51 = arith.truncf %50 : vector<8x8xf32> to vector<8x8xbf16>
    %52 = vector.shape_cast %51 : vector<8x8xbf16> to vector<1x8x8xbf16>
    %53 = vector.extract_strided_slice %11 {offsets = [0, 88], sizes = [8, 8], strides = [1, 1]} : vector<8x96xf32> to vector<8x8xf32>
    %54 = arith.truncf %53 : vector<8x8xf32> to vector<8x8xbf16>
    %55 = vector.shape_cast %54 : vector<8x8xbf16> to vector<1x8x8xbf16>
    %56 = tpu.concatenate %16, %27, %38, %49 in 0 : vector<1x8x8xbf16>, vector<1x8x8xbf16>, vector<1x8x8xbf16>, vector<1x8x8xbf16> -> vector<4x8x8xbf16>
    %57 = tpu.concatenate %19, %30, %41, %52 in 0 : vector<1x8x8xbf16>, vector<1x8x8xbf16>, vector<1x8x8xbf16>, vector<1x8x8xbf16> -> vector<4x8x8xbf16>
    %58 = tpu.concatenate %22, %33, %44, %55 in 0 : vector<1x8x8xbf16>, vector<1x8x8xbf16>, vector<1x8x8xbf16>, vector<1x8x8xbf16> -> vector<4x8x8xbf16>
    "tpu.trace_start"() <{level = 10 : i32, message = "bsd,btd->bst"}> : () -> ()
    %cst_12 = arith.constant dense<0.000000e+00> : vector<4x8x8xf32>
    %59 = tpu.matmul %56, %57, %cst_12 {dimension_numbers = #tpu.dot_dimension_numbers<[2], [2], [1], [1], [0, 0, 0, 1, 1, 1], [0], [0]>} : vector<4x8x8xbf16>, vector<4x8x8xbf16>, vector<4x8x8xf32> -> vector<4x8x8xf32>
    "tpu.trace_stop"() : () -> ()
    %cst_13 = arith.constant dense<0xFF800000> : vector<4x8xf32>
    %60 = vector.multi_reduction <maximumf>, %59, %cst_13 [2] : vector<4x8x8xf32> to vector<4x8xf32>
    %61 = vector.shape_cast %60 : vector<4x8xf32> to vector<4x8x1xf32>
    %62 = vector.broadcast %61 : vector<4x8x1xf32> to vector<4x8x8xf32>
    %63 = arith.subf %59, %62 : vector<4x8x8xf32>
    %64 = math.exp %63 : vector<4x8x8xf32>
    %cst_14 = arith.constant dense<0.000000e+00> : vector<4x8xf32>
    %65 = vector.multi_reduction <add>, %64, %cst_14 [2] : vector<4x8x8xf32> to vector<4x8xf32>
    %66 = vector.shape_cast %65 : vector<4x8xf32> to vector<4x8x1xf32>
    %67 = tpu.reciprocal %66 {approx = true} : vector<4x8x1xf32> -> vector<4x8x1xf32>
    %68 = vector.broadcast %67 : vector<4x8x1xf32> to vector<4x8x8xf32>
    %69 = arith.mulf %64, %68 : vector<4x8x8xf32>
    %70 = arith.truncf %69 : vector<4x8x8xf32> to vector<4x8x8xbf16>
    "tpu.trace_start"() <{level = 10 : i32, message = "bst,btd->bsd"}> : () -> ()
    %cst_15 = arith.constant dense<0.000000e+00> : vector<4x8x8xf32>
    %71 = tpu.matmul %70, %58, %cst_15 {dimension_numbers = #tpu.dot_dimension_numbers<[2], [1], [1], [2], [0, 0, 0, 1, 1, 2], [0], [0]>} : vector<4x8x8xbf16>, vector<4x8x8xbf16>, vector<4x8x8xf32> -> vector<4x8x8xf32>
    "tpu.trace_stop"() : () -> ()
    %72 = vector.extract_strided_slice %71 {offsets = [0, 0, 0], sizes = [1, 8, 8], strides = [1, 1, 1]} : vector<4x8x8xf32> to vector<1x8x8xf32>
    %73 = vector.shape_cast %72 : vector<1x8x8xf32> to vector<8x8xf32>
    %74 = arith.truncf %73 : vector<8x8xf32> to vector<8x8xbf16>
    %75 = vector.extract_strided_slice %71 {offsets = [1, 0, 0], sizes = [1, 8, 8], strides = [1, 1, 1]} : vector<4x8x8xf32> to vector<1x8x8xf32>
    %76 = vector.shape_cast %75 : vector<1x8x8xf32> to vector<8x8xf32>
    %77 = arith.truncf %76 : vector<8x8xf32> to vector<8x8xbf16>
    %78 = vector.extract_strided_slice %71 {offsets = [2, 0, 0], sizes = [1, 8, 8], strides = [1, 1, 1]} : vector<4x8x8xf32> to vector<1x8x8xf32>
    %79 = vector.shape_cast %78 : vector<1x8x8xf32> to vector<8x8xf32>
    %80 = arith.truncf %79 : vector<8x8xf32> to vector<8x8xbf16>
    %81 = vector.extract_strided_slice %71 {offsets = [3, 0, 0], sizes = [1, 8, 8], strides = [1, 1, 1]} : vector<4x8x8xf32> to vector<1x8x8xf32>
    %82 = vector.shape_cast %81 : vector<1x8x8xf32> to vector<8x8xf32>
    %83 = arith.truncf %82 : vector<8x8xf32> to vector<8x8xbf16>
    %84 = tpu.concatenate %74, %77, %80, %83 in 1 : vector<8x8xbf16>, vector<8x8xbf16>, vector<8x8xbf16>, vector<8x8xbf16> -> vector<8x32xbf16>
    %c0_16 = arith.constant 0 : index
    %c0_17 = arith.constant 0 : index
    %c0_18 = arith.constant 0 : index
    %85 = vector.load %arg9[%c0_16, %c0_17, %c0_18] : memref<1x32x32xbf16, #tpu.memory_space<vmem>>, vector<1x32x32xbf16>
    %86 = vector.shape_cast %85 : vector<1x32x32xbf16> to vector<32x32xbf16>
    %cst_19 = arith.constant dense<0.000000e+00> : vector<8x32xf32>
    %87 = tpu.matmul %84, %86, %cst_19 {dimension_numbers = #tpu.dot_dimension_numbers<[1], [1], [0], [0], [0, 0, 1, 0], [], []>} : vector<8x32xbf16>, vector<32x32xbf16>, vector<8x32xf32> -> vector<8x32xf32>
    %c0_20 = arith.constant 0 : index
    %c0_21 = arith.constant 0 : index
    %c0_22 = arith.constant 0 : index
    %88 = vector.load %arg10[%c0_20, %c0_21, %c0_22] : memref<1x1x32xf32, #tpu.memory_space<vmem>>, vector<1x1x32xf32>
    %89 = vector.shape_cast %88 : vector<1x1x32xf32> to vector<1x32xf32>
    %90 = vector.broadcast %89 : vector<1x32xf32> to vector<8x32xf32>
    %91 = arith.addf %87, %90 : vector<8x32xf32>
    %92 = arith.addf %3, %91 : vector<8x32xf32>
    %c0_23 = arith.constant 0 : index
    %c0_24 = arith.constant 0 : index
    %c0_25 = arith.constant 0 : index
    %93 = vector.load %arg11[%c0_23, %c0_24, %c0_25] : memref<1x1x32xf32, #tpu.memory_space<vmem>>, vector<1x1x32xf32>
    %94 = vector.shape_cast %93 : vector<1x1x32xf32> to vector<1x32xf32>
    %c0_26 = arith.constant 0 : index
    %c0_27 = arith.constant 0 : index
    %c0_28 = arith.constant 0 : index
    %95 = vector.load %arg12[%c0_26, %c0_27, %c0_28] : memref<1x1x32xf32, #tpu.memory_space<vmem>>, vector<1x1x32xf32>
    %96 = vector.shape_cast %95 : vector<1x1x32xf32> to vector<1x32xf32>
    %cst_29 = arith.constant dense<0.000000e+00> : vector<8xf32>
    %97 = vector.multi_reduction <add>, %92, %cst_29 [1] : vector<8x32xf32> to vector<8xf32>
    %98 = vector.shape_cast %97 : vector<8xf32> to vector<8x1xf32>
    %cst_30 = arith.constant 3.200000e+01 : f32
    %99 = vector.broadcast %cst_30 : f32 to vector<8x1xf32>
    %100 = arith.divf %98, %99 : vector<8x1xf32>
    %101 = vector.broadcast %100 : vector<8x1xf32> to vector<8x32xf32>
    %102 = arith.subf %92, %101 : vector<8x32xf32>
    %103 = arith.mulf %102, %102 : vector<8x32xf32>
    %cst_31 = arith.constant dense<0.000000e+00> : vector<8xf32>
    %104 = vector.multi_reduction <add>, %103, %cst_31 [1] : vector<8x32xf32> to vector<8xf32>
    %105 = vector.shape_cast %104 : vector<8xf32> to vector<8x1xf32>
    %cst_32 = arith.constant 3.200000e+01 : f32
    %106 = vector.broadcast %cst_32 : f32 to vector<8x1xf32>
    %107 = arith.divf %105, %106 : vector<8x1xf32>
    %108 = vector.broadcast %100 : vector<8x1xf32> to vector<8x32xf32>
    %109 = arith.subf %92, %108 : vector<8x32xf32>
    %cst_33 = arith.constant 9.99999974E-6 : f32
    %110 = vector.broadcast %cst_33 : f32 to vector<8x1xf32>
    %111 = arith.addf %107, %110 : vector<8x1xf32>
    %112 = math.rsqrt %111 : vector<8x1xf32>
    %113 = vector.broadcast %112 : vector<8x1xf32> to vector<8x32xf32>
    %114 = arith.mulf %109, %113 : vector<8x32xf32>
    %115 = vector.broadcast %94 : vector<1x32xf32> to vector<8x32xf32>
    %116 = arith.mulf %114, %115 : vector<8x32xf32>
    %117 = vector.broadcast %96 : vector<1x32xf32> to vector<8x32xf32>
    %118 = arith.addf %116, %117 : vector<8x32xf32>
    %c0_34 = arith.constant 0 : index
    %c0_35 = arith.constant 0 : index
    %c0_36 = arith.constant 0 : index
    %119 = vector.load %arg13[%c0_34, %c0_35, %c0_36] : memref<1x2048x32xbf16, #tpu.memory_space<vmem>>, vector<1x2048x32xbf16>
    %120 = vector.shape_cast %119 : vector<1x2048x32xbf16> to vector<2048x32xbf16>
    %121 = arith.truncf %118 : vector<8x32xf32> to vector<8x32xbf16>
    %cst_37 = arith.constant dense<0.000000e+00> : vector<8x2048xf32>
    %122 = tpu.matmul %121, %120, %cst_37 {dimension_numbers = #tpu.dot_dimension_numbers<[1], [1], [0], [0], [0, 0, 1, 0], [], []>} : vector<8x32xbf16>, vector<2048x32xbf16>, vector<8x2048xf32> -> vector<8x2048xf32>
    %c0_38 = arith.constant 0 : index
    %c0_39 = arith.constant 0 : index
    %c0_40 = arith.constant 0 : index
    %123 = vector.load %arg14[%c0_38, %c0_39, %c0_40] : memref<1x1x2048xf32, #tpu.memory_space<vmem>>, vector<1x1x2048xf32>
    %124 = vector.shape_cast %123 : vector<1x1x2048xf32> to vector<1x2048xf32>
    %125 = vector.broadcast %124 : vector<1x2048xf32> to vector<8x2048xf32>
    %126 = arith.addf %122, %125 : vector<8x2048xf32>
    %cst_41 = arith.constant 0.000000e+00 : f32
    %127 = vector.broadcast %cst_41 : f32 to vector<8x2048xf32>
    %128 = arith.maximumf %126, %127 : vector<8x2048xf32>
    %129 = arith.truncf %128 : vector<8x2048xf32> to vector<8x2048xbf16>
    %c0_42 = arith.constant 0 : index
    %c0_43 = arith.constant 0 : index
    %c0_44 = arith.constant 0 : index
    %130 = vector.load %arg15[%c0_42, %c0_43, %c0_44] : memref<1x32x2048xbf16, #tpu.memory_space<vmem>>, vector<1x32x2048xbf16>
    %131 = vector.shape_cast %130 : vector<1x32x2048xbf16> to vector<32x2048xbf16>
    %cst_45 = arith.constant dense<0.000000e+00> : vector<8x32xf32>
    %132 = tpu.matmul %129, %131, %cst_45 {dimension_numbers = #tpu.dot_dimension_numbers<[1], [1], [0], [0], [0, 0, 1, 0], [], []>} : vector<8x2048xbf16>, vector<32x2048xbf16>, vector<8x32xf32> -> vector<8x32xf32>
    %c0_46 = arith.constant 0 : index
    %c0_47 = arith.constant 0 : index
    %c0_48 = arith.constant 0 : index
    %133 = vector.load %arg16[%c0_46, %c0_47, %c0_48] : memref<1x1x32xf32, #tpu.memory_space<vmem>>, vector<1x1x32xf32>
    %134 = vector.shape_cast %133 : vector<1x1x32xf32> to vector<1x32xf32>
    %135 = vector.broadcast %134 : vector<1x32xf32> to vector<8x32xf32>
    %136 = arith.addf %132, %135 : vector<8x32xf32>
    %137 = arith.addf %118, %136 : vector<8x32xf32>
    %c0_49 = arith.constant 0 : index
    %c0_50 = arith.constant 0 : index
    %c0_51 = arith.constant 0 : index
    %138 = vector.load %arg17[%c0_49, %c0_50, %c0_51] : memref<1x1x32xf32, #tpu.memory_space<vmem>>, vector<1x1x32xf32>
    %139 = vector.shape_cast %138 : vector<1x1x32xf32> to vector<1x32xf32>
    %c0_52 = arith.constant 0 : index
    %c0_53 = arith.constant 0 : index
    %c0_54 = arith.constant 0 : index
    %140 = vector.load %arg18[%c0_52, %c0_53, %c0_54] : memref<1x1x32xf32, #tpu.memory_space<vmem>>, vector<1x1x32xf32>
    %141 = vector.shape_cast %140 : vector<1x1x32xf32> to vector<1x32xf32>
    %cst_55 = arith.constant dense<0.000000e+00> : vector<8xf32>
    %142 = vector.multi_reduction <add>, %137, %cst_55 [1] : vector<8x32xf32> to vector<8xf32>
    %143 = vector.shape_cast %142 : vector<8xf32> to vector<8x1xf32>
    %cst_56 = arith.constant 3.200000e+01 : f32
    %144 = vector.broadcast %cst_56 : f32 to vector<8x1xf32>
    %145 = arith.divf %143, %144 : vector<8x1xf32>
    %146 = vector.broadcast %145 : vector<8x1xf32> to vector<8x32xf32>
    %147 = arith.subf %137, %146 : vector<8x32xf32>
    %148 = arith.mulf %147, %147 : vector<8x32xf32>
    %cst_57 = arith.constant dense<0.000000e+00> : vector<8xf32>
    %149 = vector.multi_reduction <add>, %148, %cst_57 [1] : vector<8x32xf32> to vector<8xf32>
    %150 = vector.shape_cast %149 : vector<8xf32> to vector<8x1xf32>
    %cst_58 = arith.constant 3.200000e+01 : f32
    %151 = vector.broadcast %cst_58 : f32 to vector<8x1xf32>
    %152 = arith.divf %150, %151 : vector<8x1xf32>
    %153 = vector.broadcast %145 : vector<8x1xf32> to vector<8x32xf32>
    %154 = arith.subf %137, %153 : vector<8x32xf32>
    %cst_59 = arith.constant 9.99999974E-6 : f32
    %155 = vector.broadcast %cst_59 : f32 to vector<8x1xf32>
    %156 = arith.addf %152, %155 : vector<8x1xf32>
    %157 = math.rsqrt %156 : vector<8x1xf32>
    %158 = vector.broadcast %157 : vector<8x1xf32> to vector<8x32xf32>
    %159 = arith.mulf %154, %158 : vector<8x32xf32>
    %160 = vector.broadcast %139 : vector<1x32xf32> to vector<8x32xf32>
    %161 = arith.mulf %159, %160 : vector<8x32xf32>
    %162 = vector.broadcast %141 : vector<1x32xf32> to vector<8x32xf32>
    %163 = arith.addf %161, %162 : vector<8x32xf32>
    %c0_60 = arith.constant 0 : index
    %c0_61 = arith.constant 0 : index
    %164 = vector.load %arg20[%c0_60, %c0_61] : memref<8x32xf32, #tpu.memory_space<vmem>>, vector<8x32xf32>
    tpu.vector_store %arg20[%c0_60, %c0_61], %163 {strides = array<i32>} : memref<8x32xf32, #tpu.memory_space<vmem>>, vector<8x32xf32>,
    %c1_i32 = arith.constant 1 : i32
    %165 = arith.cmpi eq, %arg1, %c1_i32 : i32
    %166 = arith.extui %165 : i1 to i32
    %c0_i32_62 = arith.constant 0 : i32
    %167 = arith.cmpi ne, %166, %c0_i32_62 : i32
    scf.if %167 {
      %c0_63 = arith.constant 0 : index
      %c0_64 = arith.constant 0 : index
      %168 = vector.load %arg5[%c0_63, %c0_64] : memref<128x32xbf16, #tpu.memory_space<vmem>>, vector<128x32xbf16>
      %169 = arith.truncf %163 : vector<8x32xf32> to vector<8x32xbf16>
      %cst_65 = arith.constant dense<0.000000e+00> : vector<8x128xf32>
      %170 = tpu.matmul %169, %168, %cst_65 {dimension_numbers = #tpu.dot_dimension_numbers<[1], [1], [0], [0], [0, 0, 1, 0], [], []>} : vector<8x32xbf16>, vector<128x32xbf16>, vector<8x128xf32> -> vector<8x128xf32>
      %c0_66 = arith.constant 0 : index
      %c0_67 = arith.constant 0 : index
      %171 = vector.load %arg6[%c0_66, %c0_67] : memref<1x128xf32, #tpu.memory_space<vmem>>, vector<1x128xf32>
      %172 = vector.broadcast %171 : vector<1x128xf32> to vector<8x128xf32>
      %173 = arith.addf %170, %172 : vector<8x128xf32>
      %174 = vector.shape_cast %173 : vector<8x128xf32> to vector<1x8x128xf32>
      %c0_68 = arith.constant 0 : index
      %c0_69 = arith.constant 0 : index
      %c0_70 = arith.constant 0 : index
      %175 = vector.load %arg19[%c0_68, %c0_69, %c0_70] : memref<1x8x128xf32, #tpu.memory_space<vmem>>, vector<1x8x128xf32>
      tpu.vector_store %arg19[%c0_68, %c0_69, %c0_70], %174 {strides = array<i32>} : memref<1x8x128xf32, #tpu.memory_space<vmem>>, vector<1x8x128xf32>,
    } else {
    }
    return
  }
  func.func @transform_0(%arg0: i32, %arg1: i32) -> (i32, i32, i32) {
    %c0_i32 = arith.constant 0 : i32
    %c0_i32_0 = arith.constant 0 : i32
    %c0_i32_1 = arith.constant 0 : i32
    return %arg0, %c0_i32, %c0_i32_0 : i32, i32, i32
  }
  func.func @transform_1(%arg0: i32, %arg1: i32) -> (i32, i32) {
    %c0_i32 = arith.constant 0 : i32
    %c0_i32_0 = arith.constant 0 : i32
    %c0_i32_1 = arith.constant 0 : i32
    return %c0_i32, %c0_i32_0 : i32, i32
  }
  func.func @transform_2(%arg0: i32, %arg1: i32) -> (i32, i32) {
    %c0_i32 = arith.constant 0 : i32
    %c0_i32_0 = arith.constant 0 : i32
    %c0_i32_1 = arith.constant 0 : i32
    return %c0_i32, %c0_i32_0 : i32, i32
  }
  func.func @transform_3(%arg0: i32, %arg1: i32) -> (i32, i32) {
    %c0_i32 = arith.constant 0 : i32
    %c0_i32_0 = arith.constant 0 : i32
    %c0_i32_1 = arith.constant 0 : i32
    return %c0_i32, %c0_i32_0 : i32, i32
  }
  func.func @transform_4(%arg0: i32, %arg1: i32) -> (i32, i32) {
    %c0_i32 = arith.constant 0 : i32
    %c0_i32_0 = arith.constant 0 : i32
    %c0_i32_1 = arith.constant 0 : i32
    return %c0_i32, %c0_i32_0 : i32, i32
  }
  func.func @transform_5(%arg0: i32, %arg1: i32) -> (i32, i32, i32) {
    %c0_i32 = arith.constant 0 : i32
    %c0_i32_0 = arith.constant 0 : i32
    %c0_i32_1 = arith.constant 0 : i32
    return %arg1, %c0_i32, %c0_i32_0 : i32, i32, i32
  }
  func.func @transform_6(%arg0: i32, %arg1: i32) -> (i32, i32, i32) {
    %c0_i32 = arith.constant 0 : i32
    %c0_i32_0 = arith.constant 0 : i32
    %c0_i32_1 = arith.constant 0 : i32
    return %arg1, %c0_i32, %c0_i32_0 : i32, i32, i32
  }
  func.func @transform_7(%arg0: i32, %arg1: i32) -> (i32, i32, i32) {
    %c0_i32 = arith.constant 0 : i32
    %c0_i32_0 = arith.constant 0 : i32
    %c0_i32_1 = arith.constant 0 : i32
    return %arg1, %c0_i32, %c0_i32_0 : i32, i32, i32
  }
  func.func @transform_8(%arg0: i32, %arg1: i32) -> (i32, i32, i32) {
    %c0_i32 = arith.constant 0 : i32
    %c0_i32_0 = arith.constant 0 : i32
    %c0_i32_1 = arith.constant 0 : i32
    return %arg1, %c0_i32, %c0_i32_0 : i32, i32, i32
  }
  func.func @transform_9(%arg0: i32, %arg1: i32) -> (i32, i32, i32) {
    %c0_i32 = arith.constant 0 : i32
    %c0_i32_0 = arith.constant 0 : i32
    %c0_i32_1 = arith.constant 0 : i32
    return %arg1, %c0_i32, %c0_i32_0 : i32, i32, i32
  }
  func.func @transform_10(%arg0: i32, %arg1: i32) -> (i32, i32, i32) {
    %c0_i32 = arith.constant 0 : i32
    %c0_i32_0 = arith.constant 0 : i32
    %c0_i32_1 = arith.constant 0 : i32
    return %arg1, %c0_i32, %c0_i32_0 : i32, i32, i32
  }
  func.func @transform_11(%arg0: i32, %arg1: i32) -> (i32, i32, i32) {
    %c0_i32 = arith.constant 0 : i32
    %c0_i32_0 = arith.constant 0 : i32
    %c0_i32_1 = arith.constant 0 : i32
    return %arg1, %c0_i32, %c0_i32_0 : i32, i32, i32
  }
  func.func @transform_12(%arg0: i32, %arg1: i32) -> (i32, i32, i32) {
    %c0_i32 = arith.constant 0 : i32
    %c0_i32_0 = arith.constant 0 : i32
    %c0_i32_1 = arith.constant 0 : i32
    return %arg1, %c0_i32, %c0_i32_0 : i32, i32, i32
  }
  func.func @transform_13(%arg0: i32, %arg1: i32) -> (i32, i32, i32) {
    %c0_i32 = arith.constant 0 : i32
    %c0_i32_0 = arith.constant 0 : i32
    %c0_i32_1 = arith.constant 0 : i32
    return %arg1, %c0_i32, %c0_i32_0 : i32, i32, i32
  }
  func.func @transform_14(%arg0: i32, %arg1: i32) -> (i32, i32, i32) {
    %c0_i32 = arith.constant 0 : i32
    %c0_i32_0 = arith.constant 0 : i32
    %c0_i32_1 = arith.constant 0 : i32
    return %arg1, %c0_i32, %c0_i32_0 : i32, i32, i32
  }
  func.func @transform_15(%arg0: i32, %arg1: i32) -> (i32, i32, i32) {
    %c0_i32 = arith.constant 0 : i32
    %c0_i32_0 = arith.constant 0 : i32
    %c0_i32_1 = arith.constant 0 : i32
    return %arg1, %c0_i32, %c0_i32_0 : i32, i32, i32
  }
  func.func @transform_16(%arg0: i32, %arg1: i32) -> (i32, i32, i32) {
    %c0_i32 = arith.constant 0 : i32
    %c0_i32_0 = arith.constant 0 : i32
    %c0_i32_1 = arith.constant 0 : i32
    return %arg1, %c0_i32, %c0_i32_0 : i32, i32, i32
  }
  func.func @transform_17(%arg0: i32, %arg1: i32) -> (i32, i32, i32) {
    %c0_i32 = arith.constant 0 : i32
    %c0_i32_0 = arith.constant 0 : i32
    %c0_i32_1 = arith.constant 0 : i32
    return %arg0, %c0_i32, %c0_i32_0 : i32, i32, i32
  }
}

</mosaic_0001>

<bundles_post_ra>
// kernel: tpu_custom_call.1
= control target key start
LH: loop header
LB: loop body
LE: loop exit
PB: predicated region body
PF: predicated region fallthrough
CT: control target
= control target key end

     0   :  { %s5514_s0 = inlined_call_operand.vmem [shape: f32[2,8,16], index: 0, kind: input, shape index: {}]   ;;  %s5515_s1 = inlined_call_operand.vmem [shape: bf16[32,16], index: 1, kind: input, shape index: {}]   ;;  %s5516_s2 = inlined_call_operand.vmem [shape: f32[1,32], index: 2, kind: input, shape index: {}]   ;;  %s5517_s3 = inlined_call_operand.vmem [shape: bf16[128,32], index: 3, kind: input, shape index: {}]   ;;  %s5518_s4 = inlined_call_operand.vmem [shape: f32[1,128], index: 4, kind: input, shape index: {}]   ;;  %s5519_s5 = inlined_call_operand.vmem [shape: bf16[2,96,32], index: 5, kind: input, shape index: {}]   ;;  %s5520_s6 = inlined_call_operand.vmem [shape: f32[2,1,96], index: 6, kind: input, shape index: {}]   ;;  %s5521_s7 = inlined_call_operand.vmem [shape: bf16[2,32,32], index: 7, kind: input, shape index: {}]   ;;  %s5522_s8 = inlined_call_operand.vmem [shape: f32[2,1,32], index: 8, kind: input, shape index: {}]   ;;  %s5523_s9 = inlined_call_operand.vmem [shape: f32[2,1,32], index: 9, kind: input, shape index: {}]   ;;  %s5524_s10 = inlined_call_operand.vmem [shape: f32[2,1,32], index: 10, kind: input, shape index: {}]   ;;  %s5525_s11 = inlined_call_operand.vmem [shape: bf16[2,2048,32], index: 11, kind: input, shape index: {}]   ;;  %s5526_s12 = inlined_call_operand.vmem [shape: f32[2,1,2048], index: 12, kind: input, shape index: {}]   ;;  %s5527_s13 = inlined_call_operand.vmem [shape: bf16[2,32,2048], index: 13, kind: input, shape index: {}]   ;;  %s5528_s14 = inlined_call_operand.vmem [shape: f32[2,1,32], index: 14, kind: input, shape index: {}]   ;;  %s5529_s15 = inlined_call_operand.vmem [shape: f32[2,1,32], index: 15, kind: input, shape index: {}]   ;;  %s5530_s16 = inlined_call_operand.vmem [shape: f32[2,1,32], index: 16, kind: input, shape index: {}]   ;;  %s5531_s17 = inlined_call_operand.hbm [shape: f32[2,8,128], index: 17, kind: output, shape index: {}]  }
   0x1   :  { %5549 = sst [smem:[#allocation19_spill]] %s5514_s0 }
   0x2   :  { %5550 = sst [smem:[#allocation20_spill]] %s5515_s1 }
   0x3   :  { %5551 = sst [smem:[#allocation21_spill]] %s5516_s2 }
   0x4   :  { %5552 = sst [smem:[#allocation22_spill]] %s5517_s3 }
   0x5   :  { %5553 = sst [smem:[#allocation23_spill]] %s5518_s4 }
   0x6   :  { %5554 = sst [smem:[#allocation24_spill]] %s5519_s5 }
   0x7   :  { %5555 = sst [smem:[#allocation25_spill]] %s5520_s6 }
   0x8   :  { %5556 = sst [smem:[#allocation26_spill]] %s5521_s7 }
   0x9   :  { %5557 = sst [smem:[#allocation27_spill]] %s5525_s11 }
   0xa   :  { %5558 = sst [smem:[#allocation28_spill]] %s5531_s17 }
   0xb   :  { %22 = vsyncpa [#allocation4], 0 }
   0xc   :  { %24 = vsyncpa [#allocation4 + $0x1], 0  ;;  %s4796_s24 = smov 0   ;;  %s4798_s25 = smov 0  }
   0xd   :  { %s4800_s26 = smov 0   ;;  %s4802_s27 = smov 0  }
   0xe   :  { %5559 = sst [smem:[#allocation6_spill]] %s4802_s27  ;;  %s4804_s28 = smov 0  }
   0xf   :  { %s4806_s29 = smov 0   ;;  %s4808_s0 = smov 0  }
  0x10   :  { %s4810_s30 = smov 0  }
  0x11 LB: > { %s5561_s27 = sld [smem:[#allocation6_spill]]  ;;  %s3547_s18 = sadd.s32 4294967295, %s4695_s30   ;;  %s4695_s30 = sphi %s4810_s30, %s30_s30   ;;  %s4691_s0 = sphi %s4808_s0, %s5610_s0   ;;  %s4687_s29 = sphi %s4806_s29, %s5609_s29   ;;  %s4683_s28 = sphi %s4804_s28, %s5608_s28   ;;  %s4675_s26 = sphi %s4800_s26, %s5606_s26   ;;  %s4671_s25 = sphi %s4798_s25, %s5605_s25   ;;  %s4667_s24 = sphi %s4796_s24, %s5604_s24  }
  0x12   : > { %5562 = sst [smem:[#allocation6_spill]] %s4667_s24  ;;  %s3548_s19 = sadd.s32 4294967294, %s4695_s30  }
  0x13   : > { %5563 = sst [smem:[#allocation7_spill]] %s4671_s25  ;;  %s39_s1 = sadd.s32 1, %s4687_s29 }
  0x14   : > { %5564 = sst [smem:[#allocation8_spill]] %s4675_s26  ;;  %p40_p0 = scmp.ge.s32.totalorder %s39_s1, 2 }
  0x15   : > { %5566 = sst [smem:[#allocation10_spill]] %s4683_s28  ;;  %s42_s20 = sadd.s32 1, %s4691_s0 }
  0x16   : > { %5567 = sst [smem:[#allocation11_spill]] %s4687_s29  ;;  %p481_p1 = scmp.ne.s32.totalorder %s4675_s26, %s4671_s25 }
  0x17   : > { %5565 = sst [smem:[#allocation9_spill]] %s5561_s27  ;;  %p482_p2 = scmp.eq.s32.totalorder %s3547_s18, 3 }
  0x18   : > { %5568 = sst [smem:[#allocation12_spill]] %s4691_s0  ;;  %s5613_s1 = smov (%p40_p0, %s39_s1), 0 }
  0x19   : > { %5569 = sst [smem:[#allocation13_spill]] %s4695_s30  ;;  %s5615_s20 = smov (!%p40_p0, %s42_s20), %s4691_s0 }
  0x1a   : > { %5570 = sst [smem:[#allocation14_spill]] %s5613_s1  ;;  %p4845_p3 = por %p482_p2, %p481_p1 }
  0x1b   : > { %p487_p4 = scmp.ne.s32.totalorder %s4671_s25, %s4667_s24  ;;  %p44_p5 = scmp.ge.s32.totalorder %s5615_s20, 2 }
  0x1c   : > { %s5571_s21 = scalar_select %p4845_p3, 1, 0 }
  0x1d   : > { %p488_p6 = scmp.eq.s32.totalorder %s3548_s19, 3  ;;  %p3551_p7 = scmp.ge.s32.totalorder %s4695_s30, 1 }
  0x1e   : > { %5572 = sst [smem:[#allocation15_spill]] %s5571_s21  ;;  %p606_p8 = scmp.lt.s32.totalorder %s4695_s30, 5 }
  0x1f   : > { %s5617_s20 = smov (%p44_p5, %s5615_s20), 0  ;;  %p4855_p9 = por %p488_p6, %p487_p4 }
  0x20   : > { %5573 = sst [smem:[#allocation16_spill]] %s5617_s20  ;;  %p607_p10 = pnand %p3551_p7, %p606_p8 }
  0x21   : > { %s5574_s22 = scalar_select %p4855_p9, 1, 0 }
  0x22   : > { %s468_s23 = ssub.s32 %s4691_s0, %s5617_s20  ;;  %s471_s18 = sadd.s32 1, %s4675_s26 }
  0x23   : > { %5575 = sst [smem:[#allocation17_spill]] %s5574_s22  ;;  %p469_p11 = scmp.eq.s32.totalorder %s468_s23, 0 }
  0x24   : > { %610 = sbr.rel (%p607_p10) target bundleno = 2575 (0xa0f), region = 88  ;;  %s5538_s19 = sand.u32 (!%p607_p10), 1, %s4671_s25  }
  0x25   : > { %s4863_s1 = scalar_select %p469_p11, %s4675_s26, %s471_s18  }
  0x26   : > { %p702_p12 = scmp.lt.s32.totalorder (!%p607_p10), %s4683_s28, 1  ;;  %s4869_s29 = sshll.u32 (!%p607_p10), %s5538_s19, 3 }
  0x27   : > { %5576 = sst [smem:[#allocation18_spill]] %s4863_s1  ;;  %p706_p13 = scmp.lt.s32.totalorder (!%p607_p10), %s5561_s27, 1 }
  0x28   : > { %s5577_s0 = sld [smem:[#allocation19_spill]] (!%p607_p10) }
  0x29   : > { %s703_s22 = scalar_select %p702_p12, %s4683_s28, 1 }
  0x2a   : > { %s4874_s24 = scalar_select %p706_p13, %s5561_s27, 1 }
  0x2b   : > { %s3553_s23 = sshll.u32 %s703_s22, 3  ;;  %s5579_s5 = sld [smem:[#allocation24_spill]] }
  0x2c   : > { %s4489_s1 = smul.u32 48, %s4874_s24  ;;  %s4308_s21 = sshll.u32 %s4874_s24, 4 }
  0x2d   : > { %s5580_s7 = sld [smem:[#allocation26_spill]]  ;;  %s4309_s25 = sshll.u32 %s4874_s24, 10 }
  0x2e   : > { %s705_s19 = scalar_lea.vmem %s5577_s0, %s3553_s23  ;;  %s5581_s11 = sld [smem:[#allocation27_spill]] }
  0x2f   : > { %s4310_s20 = sshll.u32 %s4874_s24, 8  ;;  %s750_s3 = scalar_lea.vmem %s5530_s16, %s4874_s24 }
  0x30   : > { %s4926_s17 = scalar_lea.vmem %s5527_s13, %s4310_s20  ;;  %s5582_s22 = sld [smem:[#allocation9_spill]] }
  0x31   : > { %s4888_s4 = scalar_lea.vmem %s5579_s5, %s4489_s1 }
  0x33   : > { %s4893_s2 = scalar_lea.vmem %s5580_s7, %s4308_s21  ;;  %s4916_s7 = scalar_lea.vmem %s5526_s12, %s4308_s21 }
  0x34   : > { %s4911_s5 = scalar_lea.vmem %s5581_s11, %s4309_s25  ;;  %s747_s25 = scalar_lea.vmem %s5529_s15, %s4874_s24 }
  0x35   : > { %s701_s21 = scalar_lea.vmem [#allocation3], %s4869_s29 }
  0x36   : > { %p3562_p0 = scmp.ne.s32.totalorder %s5582_s22, 0 }
  0x37   : > { %s5583_s0 = sld [smem:[#allocation20_spill]] (!%p3562_p0) }
  0x38   : > { %755 = sbr.rel (%p3562_p0) target bundleno = 212 (0xd4), region = 92  ;;  %s5585_s30 = sld [smem:[#allocation21_spill]] (!%p3562_p0) }
  0x3d   : > { %s5584_s27 = smov %s5583_s0  ;;  %v4312_v0 = vld [vmem:[%s5583_s0 + $0x8] sm:$0xff]  ;;  %vm776_vm0 = vcmask 130048   ;;  %v756_v4 = vld [vmem:[%s705_s19] sm:$0xff]  ;;  %vm799_vm1 = vcmask 261120  }
  0x3e   : > { %v784_v1 = vsel %vm776_vm0, %v4312_v0, 0  ;;  %v4311_v2 = vld [vmem:[%s5584_s27] sm:$0xff]  ;;  %v761_v5 = vpack.c.bf16 %v756_v4, %v756_v4 }
  0x3f   : > { %792 = vmatpush.bf16.xpose.msra.mxu0 %v784_v1  ;;  %v781_v3 = vsel %vm776_vm0, %v4311_v2, 0  ;;  %v4570_v6 = vld [vmem:[%s5585_s30] ss:$0 sm:$0xff] }
  0x47   : > { %793 = vmatpush.bf16.xpose.msra.mxu0 %v781_v3 }
  0x4e   : > { %3571 = vmatmul.msk.bf16.vlgmr.msra.gmra.mxu0 %vm776_vm0, %v761_v5 }
  0xcb   : > { %v795_v7 = vpop.f32.mrf.mxu0 }
  0xcc   : > { %v796_v8 = vadd.f32 %v4570_v6, %v795_v7 }
  0xce   : > { %800 = vst.msk [vmem:[#allocation2] sm:$0xff] %vm799_vm1, %v796_v8 }
  0xd3   : > { %v797_v9 = vpop.f32.mrf.mxu0 }
  0xd4 PF: > { %v4318_v10 = vld [vmem:[%s4888_s4 + $0x28] sm:$0xff]  ;;  %vm849_vm2 = vcmask 261120   ;;  %v4317_v12 = vld [vmem:[%s4888_s4 + $0x20] sm:$0xff]  ;;  %v4316_v14 = vld [vmem:[%s4888_s4 + $0x18] sm:$0xff]  ;;  %s5586_s28 = sld [smem:[#allocation25_spill]]  ;;  %s4697_s22 = smov 104  }
  0xd5   : > { %v869_v11 = vsel %vm849_vm2, %v4318_v10, 0  ;;  %v866_v13 = vsel %vm849_vm2, %v4317_v12, 0  ;;  %v863_v15 = vsel %vm849_vm2, %v4316_v14, 0  ;;  %v4315_v16 = vld [vmem:[%s4888_s4 + $0x10] sm:$0xff]  ;;  %v4314_v18 = vld [vmem:[%s4888_s4 + $0x8] sm:$0xff]  ;;  %v4313_v20 = vld [vmem:[%s4888_s4] sm:$0xff]  ;;  %s5588_s11 = scalar_lea.vmem %s5522_s8, %s4874_s24 }
  0xd6   : > { %873 = vmatpush.bf16.xpose.msra.mxu0 %v869_v11  ;;  %v860_v17 = vsel %vm849_vm2, %v4315_v16, 0  ;;  %v857_v19 = vsel %vm849_vm2, %v4314_v18, 0  ;;  %v854_v21 = vsel %vm849_vm2, %v4313_v20, 0  ;;  %v4959_v22 = vld [vmem:[#allocation2] sm:$0xff]  ;;  %s4698_s4 = smov 120   ;;  %s4699_s23 = smov 112  }
  0xd7   : > { %v814_v23 = vpack.c.bf16 %v4959_v22, %v4959_v22  ;;  %s4700_s0 = smov 96   ;;  %vm905_vm3 = vcmask 64512   ;;  %s4701_s26 = smov 64   ;;  %vm1047_vm4 = vcmask 1043456   ;;  %vm1149_vm5 = vcmask 130048  }
  0xd8   : > { %s4702_s20 = smov 16   ;;  %s4703_s6 = smov 24   ;;  %vm1152_vm6 = vcmask 195584  }
  0xd9   : > { %s4704_s18 = smov 8  }
  0xda   : > { %s5587_s1 = scalar_lea.vmem %s5586_s28, %s4874_s24 }
  0xdb   : > { %v4571_v24 = vld [vmem:[%s5587_s1] ss:$0 sm:$0xff]  ;;  %s5589_s1 = scalar_lea.vmem %s5523_s9, %s4874_s24 }
  0xde   : > { %874 = vmatpush.bf16.xpose.msra.mxu0 %v866_v13 }
  0xe6   : > { %875 = vmatpush.bf16.xpose.msra.mxu0 %v863_v15 }
  0xee   : > { %876 = vmatpush.bf16.xpose.msra.mxu0 %v860_v17 }
  0xf6   : > { %877 = vmatpush.bf16.xpose.msra.mxu0 %v857_v19 }
  0xfe   : > { %878 = vmatpush.bf16.xpose.msra.mxu0 %v854_v21 }
 0x105   : > { %3596 = vmatmul.msk.bf16.vlgmr.msra.gmra.mxu0 %vm849_vm2, %v814_v23 }
 0x182   : > { %v880_v25 = vpop.f32.mrf.mxu0 }
 0x183   : > { %v881_v26 = vadd.f32 %v4571_v24, %v880_v25 }
 0x185   : > { %v886_v27 = vpack.c.bf16 %v881_v26, %v881_v26  ;;  %v884_v31 = vmul.f32 0.35355338, %v881_v26 }
 0x187   : > { %899 = vrot.lane.b32.xlu1 %v886_v27, %s4697_s22  ;;  %895 = vrot.lane.b32.xlu0 %v886_v27, %s4698_s4  ;;  %v901_v28 = vunpack.c.l.b16 %v886_v27  ;;  %v885_v32 = vpack.c.bf16 %v884_v31, %v884_v31 }
 0x189   : > { %v902_v30 = vpack.c.b16 %v901_v28, %v901_v28 }
 0x18a   : > { %v882_v29 = vpop.f32.mrf.mxu0 }
 0x18f   : > { %897 = vrot.lane.b32.xlu0 %v886_v27, %s4699_s23  ;;  %903 = vrot.lane.b32.xlu1 %v902_v30, %s4700_s0 }
 0x197   : > { %888 = vrot.lane.b32.xlu0 %v885_v32, %s4698_s4 }
 0x19f   : > { %892 = vrot.lane.b32.xlu0 %v885_v32, %s4697_s22 }
 0x1f9   : > { %v900_v33 = vpop.permute.xlu1 %899  ;;  %v896_v34 = vpop.permute.xlu0 %895 }
 0x1fa   : > { %v971_v35 = vunpack.c.l.b16 %v900_v33  ;;  %v925_v36 = vunpack.c.l.b16 %v896_v34 }
 0x1fc   : > { %v4969_v37 = vpack.c.b16 %v971_v35, %v971_v35  ;;  %v4971_v38 = vpack.c.b16 %v925_v36, %v925_v36 }
 0x1fe   : > { %927 = vrot.lane.b32.xlu2 %v4971_v38, %s4700_s0  ;;  %973 = vrot.lane.b32.xlu1 %v4969_v37, %s4700_s0 }
 0x201   : > { %v898_v39 = vpop.permute.xlu0 %897  ;;  %v904_v40 = vpop.permute.xlu1 %903 }
 0x202   : > { %v948_v41 = vunpack.c.l.b16 %v898_v39  ;;  %v910_v42 = vsel %vm905_vm3, %v904_v40, 0 }
 0x203   : > { %919 = vmatpush.bf16.xpose.msra.mxu1 %v910_v42 }
 0x204   : > { %v949_v43 = vpack.c.b16 %v948_v41, %v948_v41 }
 0x206   : > { %950 = vrot.lane.b32.xlu2 %v949_v43, %s4700_s0 }
 0x209   : > { %v889_v46 = vpop.permute.xlu0 %888 }
 0x20a   : > { %3597 = vmatmul.msk.bf16.vlgmr.msra.gmra.mxu1 %vm905_vm3, %v885_v32 }
 0x20e   : > { %890 = vrot.lane.b32.xlu2 %v885_v32, %s4699_s23  ;;  %s5590_s23 = scalar_lea.vmem %s5524_s10, %s4874_s24 }
 0x211   : > { %v893_v52 = vpop.permute.xlu0 %892 }
 0x258   : > { %v928_v44 = vpop.permute.xlu2 %927 }
 0x259   : > { %v933_v45 = vsel %vm905_vm3, %v928_v44, 0 }
 0x25a   : > { %942 = vmatpush.bf16.xpose.msra.mxu2 %v933_v45 }
 0x260   : > { %v951_v47 = vpop.permute.xlu2 %950 }
 0x261   : > { %3598 = vmatmul.msk.bf16.vlgmr.msra.gmra.mxu2 %vm905_vm3, %v889_v46  ;;  %v956_v48 = vsel %vm905_vm3, %v951_v47, 0 }
 0x262   : > { %965 = vmatpush.bf16.xpose.msra.mxu3 %v956_v48 }
 0x268   : > { %v891_v49 = vpop.permute.xlu2 %890 }
 0x269   : > { %3599 = vmatmul.msk.bf16.vlgmr.msra.gmra.mxu3 %vm905_vm3, %v891_v49 }
 0x270   : > { %v974_v50 = vpop.permute.xlu1 %973 }
 0x271   : > { %v979_v51 = vsel %vm905_vm3, %v974_v50, 0 }
 0x272   : > { %988 = vmatpush.bf16.xpose.msrb.mxu1 %v979_v51 }
 0x279   : > { %3600 = vmatmul.msk.bf16.vlgmr.msrb.gmra.mxu1 %vm905_vm3, %v893_v52 }
 0x287   : > { %v921_v53 = vpop.f32.mrf.mxu1 }
 0x288   : > { %v994_v54 = vsel %vm905_vm3, %v921_v53, -inf }
 0x289   : > { %995 = vmax.xlane.f32.xlu1 %v994_v54 }
 0x28f   : > { %v923_v55 = vpop.f32.mrf.mxu1 }
 0x2e4   : > { %v944_v56 = vpop.f32.mrf.mxu2 }
 0x2e5   : > { %v997_v57 = vsel %vm905_vm3, %v944_v56, -inf }
 0x2e6   : > { %998 = vmax.xlane.f32.xlu2 %v997_v57 }
 0x2ec   : > { %v946_v58 = vpop.f32.mrf.mxu2  ;;  %v967_v59 = vpop.f32.mrf.mxu3 }
 0x2ed   : > { %v1000_v60 = vsel %vm905_vm3, %v967_v59, -inf }
 0x2ee   : > { %1001 = vmax.xlane.f32.xlu2 %v1000_v60 }
 0x2f4   : > { %v969_v61 = vpop.f32.mrf.mxu3 }
 0x2f6   : > { %v990_v62 = vpop.f32.mrf.mxu1 }
 0x2f7   : > { %v1003_v63 = vsel %vm905_vm3, %v990_v62, -inf }
 0x2f8   : > { %1004 = vmax.xlane.f32.xlu0 %v1003_v63  ;;  %v4320_v63 = vld [vmem:[%s4893_s2 + $0x8] sm:$0xff] }
 0x2fc   : > { %v996_v0 = vpop.xlane.xlu1 %995 }
 0x2fd   : > { %v1006_v1 = vsub.f32 %v921_v53, %v996_v0  ;;  %v1179_v0 = vsel %vm849_vm2, %v4320_v63, 0 }
 0x2fe   : > { %v992_v2 = vpop.f32.mrf.mxu1 }
 0x2ff   : > { %v1010_v3 = vmul.f32 1.442695, %v1006_v1  ;;  %v4319_v1 = vld [vmem:[%s4893_s2] sm:$0xff] }
 0x300   : > { %v1176_v2 = vsel %vm849_vm2, %v4319_v1, 0 }
 0x301   : > { %4578 = vpow2.f32 %v1010_v3 }
 0x306   : > { %1042 = vrot.lane.b32.xlu2 %v902_v30, %s4701_s26 }
 0x307   : > { %v4579_v4 = vpop.eup %4578 }
 0x308   : > { %v1018_v5 = vsel %vm905_vm3, %v4579_v4, 0.0 }
 0x309   : > { %1019 = vadd.xlane.f32.xlu1 %v1018_v5 }
 0x30e   : > { %1085 = vrot.lane.b32.xlu2 %v949_v43, %s4701_s26 }
 0x359   : > { %v999_v6 = vpop.xlane.xlu2 %998 }
 0x35a   : > { %v1007_v7 = vsub.f32 %v944_v56, %v999_v6 }
 0x35c   : > { %v1012_v8 = vmul.f32 1.442695, %v1007_v7 }
 0x35e   : > { %4580 = vpow2.f32 %v1012_v8 }
 0x361   : > { %v1002_v9 = vpop.xlane.xlu2 %1001 }
 0x362   : > { %v1008_v10 = vsub.f32 %v967_v59, %v1002_v9 }
 0x364   : > { %v4581_v11 = vpop.eup %4580  ;;  %v1014_v12 = vmul.f32 1.442695, %v1008_v10  ;;  %v4572_v10 = vld [vmem:[%s5588_s11] ss:$0 sm:$0xff] }
 0x365   : > { %v1021_v13 = vsel %vm905_vm3, %v4581_v11, 0.0 }
 0x366   : > { %4582 = vpow2.f32 %v1014_v12  ;;  %1022 = vadd.xlane.f32.xlu0 %v1021_v13 }
 0x369   : > { %v1043_v14 = vpop.permute.xlu2 %1042 }
 0x36a   : > { %v1049_v15 = vsel %vm1047_vm4, %v1043_v14, 0 }
 0x36b   : > { %1058 = vmatpush.bf16.msrb.mxu2 %v1049_v15  ;;  %v1005_v16 = vpop.xlane.xlu0 %1004 }
 0x36c   : > { %v4583_v17 = vpop.eup %4582  ;;  %v1009_v18 = vsub.f32 %v990_v62, %v1005_v16  ;;  %v4705_v16 = vmov 32.0  }
 0x36d   : > { %v1024_v19 = vsel %vm905_vm3, %v4583_v17, 0.0 }
 0x36e   : > { %v1016_v20 = vmul.f32 1.442695, %v1009_v18  ;;  %1025 = vadd.xlane.f32.xlu0 %v1024_v19  ;;  %v4336_v18 = vld [vmem:[%s4911_s5 + $0x78] sm:$0xff] }
 0x36f   : > { %v4344_v19 = vld [vmem:[%s4911_s5 + $0xb8] sm:$0xff] }
 0x370   : > { %4584 = vpow2.f32 %v1016_v20  ;;  %v4352_v20 = vld [vmem:[%s4911_s5 + $0xf8] sm:$0xff] }
 0x371   : > { %v1086_v21 = vpop.permute.xlu2 %1085 }
 0x372   : > { %v1091_v23 = vsel %vm1047_vm4, %v1086_v21, 0 }
 0x373   : > { %1100 = vmatpush.bf16.msra.mxu1 %v1091_v23  ;;  %v2216_v23 = vsel %vm849_vm2, %v4336_v18, 0 }
 0x376   : > { %v4585_v24 = vpop.eup %4584 }
 0x377   : > { %v1027_v25 = vsel %vm905_vm3, %v4585_v24, 0.0 }
 0x378   : > { %1028 = vadd.xlane.f32.xlu1 %v1027_v25  ;;  %v2264_v25 = vsel %vm849_vm2, %v4352_v20, 0  ;;  %v4321_v20 = vld [vmem:[%s4911_s5] sm:$0xff] }
 0x379   : > { %2593 = vmatpush.bf16.xpose.msrb.mxu0 %v2264_v25  ;;  %v4368_v25 = vld [vmem:[%s4911_s5 + $0x178] sm:$0xff] }
 0x37c   : > { %v1020_v26 = vpop.xlane.xlu1 %1019 }
 0x37d   : > { %4586 = vrcp.f32 %v1020_v26  ;;  %v4327_v26 = vld [vmem:[%s4911_s5 + $0x30] sm:$0xff] }
 0x382   : > { %1106 = vrot.lane.b32.xlu0 %v4969_v37, %s4701_s26 }
 0x383   : > { %v4587_v27 = vpop.eup %4586 }
 0x384   : > { %v1034_v28 = vmul.f32 %v4587_v27, %v4579_v4  ;;  %v4335_v27 = vld [vmem:[%s4911_s5 + $0x70] sm:$0xff] }
 0x386   : > { %v1038_v29 = vpack.c.bf16 %v1034_v28, %v1034_v28  ;;  %v4343_v28 = vld [vmem:[%s4911_s5 + $0xb0] sm:$0xff] }
 0x388   : > { %3601 = vmatmul.msk.bf16.vlgmr.msrb.gmra.mxu2 %vm905_vm3, %v1038_v29  ;;  %v4351_v29 = vld [vmem:[%s4911_s5 + $0xf0] sm:$0xff] }
 0x391   : > { %1064 = vrot.lane.b32.xlu1 %v4971_v38, %s4701_s26 }
 0x3d9   : > { %v1023_v30 = vpop.xlane.xlu0 %1022 }
 0x3e1   : > { %v1026_v31 = vpop.xlane.xlu0 %1025 }
 0x3e2   : > { %4588 = vrcp.f32 %v1026_v31  ;;  %v2189_v31 = vsel %vm849_vm2, %v4327_v26, 0  ;;  %v4376_v26 = vld [vmem:[%s4911_s5 + $0x1b8] sm:$0xff] }
 0x3e8   : > { %v4589_v32 = vpop.eup %4588 }
 0x3e9   : > { %v1036_v33 = vmul.f32 %v4589_v32, %v4583_v17  ;;  %v4328_v17 = vld [vmem:[%s4911_s5 + $0x38] sm:$0xff]  ;;  %v2213_v32 = vsel %vm849_vm2, %v4335_v27, 0 }
 0x3ea   : > { %v2192_v21 = vsel %vm849_vm2, %v4328_v17, 0  ;;  %v4384_v27 = vld [vmem:[%s4911_s5 + $0x1f8] sm:$0xff] }
 0x3eb   : > { %v1040_v34 = vpack.c.bf16 %v1036_v33, %v1036_v33  ;;  %v1029_v35 = vpop.xlane.xlu1 %1028  ;;  %2554 = vmatpush.bf16.xpose.msrb.mxu1 %v2192_v21  ;;  %v2237_v33 = vsel %vm849_vm2, %v4343_v28, 0  ;;  %v4329_v21 = vld [vmem:[%s4911_s5 + $0x40] sm:$0xff]  ;;  %v2171_v28 = vsel %vm849_vm2, %v4321_v20, 0 }
 0x3ec   : > { %4590 = vrcp.f32 %v1029_v35 }
 0x3ed   : > { %3603 = vmatmul.msk.bf16.vlgmr.msra.gmra.mxu1 %vm905_vm3, %v1040_v34  ;;  %4592 = vrcp.f32 %v1023_v30  ;;  %v2261_v34 = vsel %vm849_vm2, %v4351_v29, 0  ;;  %v2195_v29 = vsel %vm849_vm2, %v4329_v21, 0 }
 0x3ee   : > { %4594 = vrcp.f32 %v4705_v16  ;;  %2594 = vmatpush.bf16.xpose.msrb.mxu0 %v2261_v34  ;;  %v2336_v34 = vsel %vm849_vm2, %v4376_v26, 0 }
 0x3f2   : > { %v4591_v36 = vpop.eup %4590 }
 0x3f3   : > { %v1037_v37 = vmul.f32 %v4591_v36, %v4585_v24  ;;  %v4593_v38 = vpop.eup %4592  ;;  %2555 = vmatpush.bf16.xpose.msrb.mxu1 %v2189_v31  ;;  %v4326_v36 = vld [vmem:[%s4911_s5 + $0x28] sm:$0xff] }
 0x3f4   : > { %v1107_v39 = vpop.permute.xlu0 %1106  ;;  %v1035_v42 = vmul.f32 %v4593_v38, %v4581_v11  ;;  %v4595_v24 = vpop.eup %4594  ;;  %v2186_v38 = vsel %vm849_vm2, %v4326_v36, 0  ;;  %v4359_v36 = vld [vmem:[%s4911_s5 + $0x130] sm:$0xff] }
 0x3f5   : > { %v1112_v40 = vsel %vm1047_vm4, %v1107_v39, 0  ;;  %v1041_v41 = vpack.c.bf16 %v1037_v37, %v1037_v37  ;;  %v1201_v30 = vmul.f32 32.0, %v4595_v24  ;;  %v4334_v37 = vld [vmem:[%s4911_s5 + $0x68] sm:$0xff]  ;;  %vm1205_vm7 = vweird.f32 %v4595_v24 }
 0x3f6   : > { %1121 = vmatpush.bf16.msra.mxu2 %v1112_v40  ;;  %v1039_v45 = vpack.c.bf16 %v1035_v42, %v1035_v42  ;;  %v4342_v39 = vld [vmem:[%s4911_s5 + $0xa8] sm:$0xff]  ;;  %v2210_v42 = vsel %vm849_vm2, %v4334_v37, 0  ;;  %v4367_v37 = vld [vmem:[%s4911_s5 + $0x170] sm:$0xff] }
 0x3f7   : > { %v1202_v35 = vsub.f32 1.0, %v1201_v30  ;;  %v4350_v40 = vld [vmem:[%s4911_s5 + $0xe8] sm:$0xff] }
 0x3f9   : > { %3604 = vmatmul.msk.bf16.vlgmr.msra.gmra.mxu2 %vm905_vm3, %v1041_v41  ;;  %v1203_v41 = vmul.f32 %v4595_v24, %v1202_v35  ;;  %v2360_v35 = vsel %vm849_vm2, %v4384_v27, 0 }
 0x3fa   : > { %2567 = vmatpush.bf16.xpose.msrb.mxu2 %v2216_v23  ;;  %v4337_v23 = vld [vmem:[%s4911_s5 + $0x80] sm:$0xff] }
 0x3fb   : > { %2556 = vmatpush.bf16.xpose.msrb.mxu1 %v2186_v38  ;;  %v2219_v30 = vsel %vm849_vm2, %v4337_v23, 0  ;;  %v2309_v38 = vsel %vm849_vm2, %v4367_v37, 0  ;;  %v4353_v23 = vld [vmem:[%s4911_s5 + $0x100] sm:$0xff] }
 0x3fc   : > { %v2267_v26 = vsel %vm849_vm2, %v4353_v23, 0 }
 0x402   : > { %2568 = vmatpush.bf16.xpose.msrb.mxu2 %v2213_v32 }
 0x403   : > { %v1065_v43 = vpop.permute.xlu1 %1064 }
 0x404   : > { %v1070_v44 = vsel %vm1047_vm4, %v1065_v43, 0  ;;  %v2234_v43 = vsel %vm849_vm2, %v4342_v39, 0  ;;  %v4375_v39 = vld [vmem:[%s4911_s5 + $0x1b0] sm:$0xff] }
 0x405   : > { %1079 = vmatpush.bf16.msrb.mxu3 %v1070_v44  ;;  %v2258_v44 = vsel %vm849_vm2, %v4350_v40, 0  ;;  %v4383_v40 = vld [vmem:[%s4911_s5 + $0x1f0] sm:$0xff] }
 0x406   : > { %2595 = vmatpush.bf16.xpose.msrb.mxu0 %v2258_v44  ;;  %v4358_v44 = vld [vmem:[%s4911_s5 + $0x128] sm:$0xff] }
 0x408   : > { %3602 = vmatmul.msk.bf16.vlgmr.msrb.gmra.mxu3 %vm905_vm3, %v1039_v45  ;;  %v1204_v45 = vadd.f32 %v4595_v24, %v1203_v41  ;;  %v2285_v41 = vsel %vm849_vm2, %v4359_v36, 0 }
 0x409   : > { %1187 = vmatpush.bf16.xpose.msra.mxu3 %v1179_v0 }
 0x40a   : > { %2569 = vmatpush.bf16.xpose.msrb.mxu2 %v2210_v42  ;;  %v2333_v42 = vsel %vm849_vm2, %v4375_v39, 0 }
 0x40b   : > { %v1060_v46 = vpop.f32.mrf.mxu2 }
 0x40c   : > { %v1127_v4 = vpack.c.bf16 %v1060_v46, %v1060_v46  ;;  %v4325_v46 = vld [vmem:[%s4911_s5 + $0x20] sm:$0xff] }
 0x411   : > { %1188 = vmatpush.bf16.xpose.msra.mxu3 %v1176_v2 }
 0x413   : > { %v1062_v47 = vpop.f32.mrf.mxu2 }
 0x414   : > { %v4333_v47 = vld [vmem:[%s4911_s5 + $0x60] sm:$0xff] }
 0x46a   : > { %v1102_v48 = vpop.f32.mrf.mxu1 }
 0x46b   : > { %v1129_v49 = vpack.c.bf16 %v1102_v48, %v1102_v48  ;;  %v4341_v48 = vld [vmem:[%s4911_s5 + $0xa0] sm:$0xff] }
 0x46d   : > { %v1137_v50 = vunpack.c.l.b16 %v1129_v49  ;;  %v4349_v49 = vld [vmem:[%s4911_s5 + $0xe0] sm:$0xff] }
 0x46f   : > { %v1138_v51 = vpack.c.b16 %v1137_v50, %v1137_v50  ;;  %v5046_v50 = vsel %vm1205_vm7, %v4595_v24, %v1204_v45  ;;  %v4360_v24 = vld [vmem:[%s4911_s5 + $0x138] sm:$0xff]  ;;  %v4366_v45 = vld [vmem:[%s4911_s5 + $0x168] sm:$0xff] }
 0x470   : > { %v2288_v32 = vsel %vm849_vm2, %v4360_v24, 0  ;;  %v4369_v24 = vld [vmem:[%s4911_s5 + $0x180] sm:$0xff] }
 0x471   : > { %1139 = vrot.lane.b32.xlu1 %v1138_v51, %s4702_s20 }
 0x472   : > { %v1104_v52 = vpop.f32.mrf.mxu1 }
 0x473   : > { %v2183_v52 = vsel %vm849_vm2, %v4325_v46, 0  ;;  %v4374_v46 = vld [vmem:[%s4911_s5 + $0x1a8] sm:$0xff] }
 0x474   : > { %2557 = vmatpush.bf16.xpose.msrb.mxu1 %v2183_v52 }
 0x47c   : > { %v1123_v53 = vpop.f32.mrf.mxu2 }
 0x47d   : > { %v1130_v54 = vpack.c.bf16 %v1123_v53, %v1123_v53  ;;  %v2207_v53 = vsel %vm849_vm2, %v4333_v47, 0  ;;  %v4382_v47 = vld [vmem:[%s4911_s5 + $0x1e8] sm:$0xff] }
 0x47e   : > { %2570 = vmatpush.bf16.xpose.msrb.mxu2 %v2207_v53  ;;  %v2354_v52 = vsel %vm849_vm2, %v4382_v47, 0  ;;  %v4357_v53 = vld [vmem:[%s4911_s5 + $0x120] sm:$0xff]  ;;  %v4408_v47 = vld [vmem:[%s4911_s5 + $0x2b8] sm:$0xff] }
 0x47f   : > { %v1142_v55 = vunpack.c.l.b16 %v1130_v54 }
 0x481   : > { %v1143_v56 = vpack.c.b16 %v1142_v55, %v1142_v55  ;;  %v2231_v55 = vsel %vm849_vm2, %v4341_v48, 0  ;;  %v2282_v48 = vsel %vm849_vm2, %v4358_v44, 0  ;;  %v4392_v44 = vld [vmem:[%s4911_s5 + $0x238] sm:$0xff] }
 0x483   : > { %1144 = vrot.lane.b32.xlu0 %v1143_v56, %s4703_s6  ;;  %v2255_v56 = vsel %vm849_vm2, %v4349_v49, 0  ;;  %v2306_v49 = vsel %vm849_vm2, %v4366_v45, 0  ;;  %v4400_v45 = vld [vmem:[%s4911_s5 + $0x278] sm:$0xff] }
 0x484   : > { %v1125_v57 = vpop.f32.mrf.mxu2  ;;  %2596 = vmatpush.bf16.xpose.msrb.mxu0 %v2255_v56  ;;  %v4381_v56 = vld [vmem:[%s4911_s5 + $0x1e0] sm:$0xff] }
 0x48b   : > { %v1081_v58 = vpop.f32.mrf.mxu3 }
 0x48c   : > { %v1128_v59 = vpack.c.bf16 %v1081_v58, %v1081_v58  ;;  %v4324_v58 = vld [vmem:[%s4911_s5 + $0x18] sm:$0xff] }
 0x48d   : > { %v2180_v0 = vsel %vm849_vm2, %v4324_v58, 0  ;;  %v2279_v58 = vsel %vm849_vm2, %v4357_v53, 0 }
 0x48e   : > { %v1132_v60 = vunpack.c.l.b16 %v1128_v59  ;;  %v4332_v59 = vld [vmem:[%s4911_s5 + $0x58] sm:$0xff]  ;;  %2558 = vmatpush.bf16.xpose.msrb.mxu1 %v2180_v0 }
 0x48f   : > { %v2204_v1 = vsel %vm849_vm2, %v4332_v59, 0  ;;  %v4372_v0 = vld [vmem:[%s4911_s5 + $0x198] sm:$0xff] }
 0x490   : > { %v1133_v61 = vpack.c.b16 %v1132_v60, %v1132_v60  ;;  %2571 = vmatpush.bf16.xpose.msrb.mxu2 %v2204_v1  ;;  %v4380_v1 = vld [vmem:[%s4911_s5 + $0x1d8] sm:$0xff] }
 0x492   : > { %1134 = vrot.lane.b32.xlu2 %v1133_v61, %s4704_s18  ;;  %v4340_v61 = vld [vmem:[%s4911_s5 + $0x98] sm:$0xff]  ;;  %s5592_s18 = sld [smem:[#allocation9_spill]] }
 0x493   : > { %v1083_v62 = vpop.f32.mrf.mxu3  ;;  %v2228_v2 = vsel %vm849_vm2, %v4340_v61, 0  ;;  %v2351_v61 = vsel %vm849_vm2, %v4381_v56, 0  ;;  %v4407_v56 = vld [vmem:[%s4911_s5 + $0x2b0] sm:$0xff] }
 0x494   : > { %v4348_v62 = vld [vmem:[%s4911_s5 + $0xd8] sm:$0xff] }
 0x498   : > { %p4270_p1 = scmp.ne.s32.totalorder %s5592_s18, 1 }
 0x499   : > { %s5593_s11 = sld [smem:[#allocation22_spill]] (!%p4270_p1) }
 0x49a   : > { %s5594_s18 = sld [smem:[#allocation23_spill]] (!%p4270_p1) }
 0x4e3   : > { %v1140_v6 = vpop.permute.xlu1 %1139 }
 0x4ec   : > { %v1135_v3 = vpop.permute.xlu2 %1134 }
 0x4ed   : > { %v1148_v5 = vsel %vm905_vm3, %v1127_v4, %v1135_v3  ;;  %v2252_v3 = vsel %vm849_vm2, %v4348_v62, 0  ;;  %v4323_v4 = vld [vmem:[%s4911_s5 + $0x10] sm:$0xff]  ;;  %v4356_v62 = vld [vmem:[%s4911_s5 + $0x118] sm:$0xff] }
 0x4ee   : > { %v1151_v8 = vsel %vm1149_vm5, %v1148_v5, %v1140_v6  ;;  %2597 = vmatpush.bf16.xpose.msrb.mxu0 %v2252_v3  ;;  %v4331_v5 = vld [vmem:[%s4911_s5 + $0x50] sm:$0xff] }
 0x4ef   : > { %v4339_v6 = vld [vmem:[%s4911_s5 + $0x90] sm:$0xff] }
 0x4f5   : > { %v1145_v7 = vpop.permute.xlu0 %1144 }
 0x4f6   : > { %v1154_v9 = vsel %vm1152_vm6, %v1151_v8, %v1145_v7  ;;  %v4347_v7 = vld [vmem:[%s4911_s5 + $0xd0] sm:$0xff]  ;;  %v2177_v8 = vsel %vm849_vm2, %v4323_v4, 0  ;;  %v2324_v4 = vsel %vm849_vm2, %v4372_v0, 0  ;;  %v4398_v0 = vld [vmem:[%s4911_s5 + $0x268] sm:$0xff] }
 0x4f7   : > { %3613 = vmatmul.msk.bf16.vlgmr.msra.gmra.mxu3 %vm849_vm2, %v1154_v9  ;;  %v2201_v9 = vsel %vm849_vm2, %v4331_v5, 0  ;;  %2559 = vmatpush.bf16.xpose.msrb.mxu1 %v2177_v8  ;;  %v2348_v5 = vsel %vm849_vm2, %v4380_v1, 0  ;;  %v4371_v8 = vld [vmem:[%s4911_s5 + $0x190] sm:$0xff]  ;;  %v4406_v1 = vld [vmem:[%s4911_s5 + $0x2a8] sm:$0xff] }
 0x4f8   : > { %2572 = vmatpush.bf16.xpose.msrb.mxu2 %v2201_v9  ;;  %v4379_v9 = vld [vmem:[%s4911_s5 + $0x1d0] sm:$0xff] }
 0x57a   : > { %v1190_v11 = vpop.f32.mrf.mxu3 }
 0x57b   : > { %v1191_v12 = vadd.f32 %v4572_v10, %v1190_v11  ;;  %v2225_v10 = vsel %vm849_vm2, %v4339_v6, 0  ;;  %v2249_v11 = vsel %vm849_vm2, %v4347_v7, 0  ;;  %v4355_v6 = vld [vmem:[%s4911_s5 + $0x110] sm:$0xff] }
 0x57c   : > { %2598 = vmatpush.bf16.xpose.msrb.mxu0 %v2249_v11  ;;  %v4363_v7 = vld [vmem:[%s4911_s5 + $0x150] sm:$0xff] }
 0x57d   : > { %v1194_v13 = vadd.f32 %v1191_v12, %v4959_v22  ;;  %v2240_v22 = vsel %vm849_vm2, %v4344_v19, 0  ;;  %v4322_v12 = vld [vmem:[%s4911_s5 + $0x8] sm:$0xff]  ;;  %v2297_v11 = vsel %vm849_vm2, %v4363_v7, 0  ;;  %v4389_v7 = vld [vmem:[%s4911_s5 + $0x220] sm:$0xff] }
 0x57e   : > { %2580 = vmatpush.bf16.xpose.msrb.mxu3 %v2240_v22  ;;  %v2174_v16 = vsel %vm849_vm2, %v4322_v12, 0  ;;  %v4345_v22 = vld [vmem:[%s4911_s5 + $0xc0] sm:$0xff]  ;;  %v2321_v12 = vsel %vm849_vm2, %v4371_v8, 0 }
 0x57f   : > { %v1197_v14 = vsel %vm849_vm2, %v1194_v13, 0.0  ;;  %2560 = vmatpush.bf16.xpose.msrb.mxu1 %v2174_v16  ;;  %v2243_v31 = vsel %vm849_vm2, %v4345_v22, 0  ;;  %v4370_v16 = vld [vmem:[%s4911_s5 + $0x188] sm:$0xff]  ;;  %v4361_v22 = vld [vmem:[%s4911_s5 + $0x140] sm:$0xff] }
 0x580   : > { %1198 = vadd.xlane.f32.xlu2 %v1197_v14  ;;  %v4338_v14 = vld [vmem:[%s4911_s5 + $0x88] sm:$0xff]  ;;  %v2318_v20 = vsel %vm849_vm2, %v4370_v16, 0  ;;  %v2291_v27 = vsel %vm849_vm2, %v4361_v22, 0  ;;  %v4397_v8 = vld [vmem:[%s4911_s5 + $0x260] sm:$0xff]  ;;  %v4396_v16 = vld [vmem:[%s4911_s5 + $0x258] sm:$0xff] }
 0x581   : > { %v2222_v18 = vsel %vm849_vm2, %v4338_v14, 0  ;;  %v4354_v14 = vld [vmem:[%s4911_s5 + $0x108] sm:$0xff]  ;;  %v4387_v22 = vld [vmem:[%s4911_s5 + $0x210] sm:$0xff] }
 0x582   : > { %v1192_v15 = vpop.f32.mrf.mxu3 }
 0x583   : > { %v4346_v15 = vld [vmem:[%s4911_s5 + $0xc8] sm:$0xff] }
 0x584   : > { %v2246_v19 = vsel %vm849_vm2, %v4346_v15, 0  ;;  %v4362_v15 = vld [vmem:[%s4911_s5 + $0x148] sm:$0xff] }
 0x585   : > { %2599 = vmatpush.bf16.xpose.msrb.mxu0 %v2246_v19  ;;  %v2294_v19 = vsel %vm849_vm2, %v4362_v15, 0  ;;  %v4388_v15 = vld [vmem:[%s4911_s5 + $0x218] sm:$0xff] }
 0x586   : > { %2581 = vmatpush.bf16.xpose.msrb.mxu3 %v2237_v33  ;;  %v2312_v33 = vsel %vm849_vm2, %v4368_v25, 0  ;;  %v4377_v25 = vld [vmem:[%s4911_s5 + $0x1c0] sm:$0xff] }
 0x587   : > { %2561 = vmatpush.bf16.xpose.msrb.mxu1 %v2171_v28  ;;  %v2315_v28 = vsel %vm849_vm2, %v4369_v24, 0  ;;  %v4395_v24 = vld [vmem:[%s4911_s5 + $0x250] sm:$0xff] }
 0x58d   : > { %2600 = vmatpush.bf16.xpose.msrb.mxu0 %v2243_v31 }
 0x58e   : > { %2582 = vmatpush.bf16.xpose.msrb.mxu3 %v2234_v43  ;;  %v2357_v43 = vsel %vm849_vm2, %v4383_v40, 0  ;;  %v4573_v40 = vld [vmem:[%s5589_s1] ss:$0 sm:$0xff] }
 0x58f   : > { %2606 = vmatpush.bf16.xpose.msra.mxu1 %v2288_v32 }
 0x595   : > { %2645 = vmatpush.bf16.xpose.msra.mxu0 %v2360_v35 }
 0x596   : > { %2583 = vmatpush.bf16.xpose.msrb.mxu3 %v2231_v55  ;;  %v4373_v55 = vld [vmem:[%s4911_s5 + $0x1a0] sm:$0xff] }
 0x597   : > { %2607 = vmatpush.bf16.xpose.msra.mxu1 %v2285_v41 }
 0x59d   : > { %2646 = vmatpush.bf16.xpose.msra.mxu0 %v2357_v43 }
 0x59e   : > { %2584 = vmatpush.bf16.xpose.msrb.mxu3 %v2228_v2  ;;  %v2276_v2 = vsel %vm849_vm2, %v4356_v62, 0 }
 0x59f   : > { %2608 = vmatpush.bf16.xpose.msra.mxu1 %v2282_v48  ;;  %v4416_v48 = vld [vmem:[%s4911_s5 + $0x2f8] sm:$0xff] }
 0x5a0   : > { %v2456_v53 = vsel %vm849_vm2, %v4416_v48, 0 }
 0x5a5   : > { %2647 = vmatpush.bf16.xpose.msra.mxu0 %v2354_v52  ;;  %v2408_v52 = vsel %vm849_vm2, %v4400_v45, 0  ;;  %v4440_v45 = vld [vmem:[%s4911_s5 + $0x3b8] sm:$0xff] }
 0x5a6   : > { %2585 = vmatpush.bf16.xpose.msrb.mxu3 %v2225_v10  ;;  %v2273_v10 = vsel %vm849_vm2, %v4355_v6, 0 }
 0x5a7   : > { %2609 = vmatpush.bf16.xpose.msra.mxu1 %v2279_v58  ;;  %v4415_v58 = vld [vmem:[%s4911_s5 + $0x2f0] sm:$0xff] }
 0x5a8   : > { %v2453_v62 = vsel %vm849_vm2, %v4415_v58, 0  ;;  %v4423_v58 = vld [vmem:[%s4911_s5 + $0x330] sm:$0xff] }
 0x5ad   : > { %2648 = vmatpush.bf16.xpose.msra.mxu0 %v2351_v61  ;;  %v2429_v61 = vsel %vm849_vm2, %v4407_v56, 0 }
 0x5ae   : > { %2586 = vmatpush.bf16.xpose.msrb.mxu3 %v2222_v18  ;;  %v2270_v18 = vsel %vm849_vm2, %v4354_v14, 0 }
 0x5af   : > { %2610 = vmatpush.bf16.xpose.msra.mxu1 %v2276_v2  ;;  %v4414_v2 = vld [vmem:[%s4911_s5 + $0x2e8] sm:$0xff] }
 0x5b0   : > { %v2450_v6 = vsel %vm849_vm2, %v4414_v2, 0  ;;  %v4422_v2 = vld [vmem:[%s4911_s5 + $0x328] sm:$0xff] }
 0x5b5   : > { %2649 = vmatpush.bf16.xpose.msra.mxu0 %v2348_v5  ;;  %v2426_v5 = vsel %vm849_vm2, %v4406_v1, 0 }
 0x5b6   : > { %2587 = vmatpush.bf16.xpose.msrb.mxu3 %v2219_v30 }
 0x5b7   : > { %2611 = vmatpush.bf16.xpose.msra.mxu1 %v2273_v10  ;;  %v4413_v10 = vld [vmem:[%s4911_s5 + $0x2e0] sm:$0xff] }
 0x5b8   : > { %v2447_v14 = vsel %vm849_vm2, %v4413_v10, 0  ;;  %v4421_v10 = vld [vmem:[%s4911_s5 + $0x320] sm:$0xff] }
 0x5be   : > { %2632 = vmatpush.bf16.xpose.msra.mxu3 %v2336_v34 }
 0x5bf   : > { %2612 = vmatpush.bf16.xpose.msra.mxu1 %v2270_v18  ;;  %v4412_v18 = vld [vmem:[%s4911_s5 + $0x2d8] sm:$0xff] }
 0x5c0   : > { %v2444_v23 = vsel %vm849_vm2, %v4412_v18, 0  ;;  %v4420_v18 = vld [vmem:[%s4911_s5 + $0x318] sm:$0xff] }
 0x5c6   : > { %2633 = vmatpush.bf16.xpose.msra.mxu3 %v2333_v42 }
 0x5c7   : > { %2613 = vmatpush.bf16.xpose.msra.mxu1 %v2267_v26  ;;  %v4411_v26 = vld [vmem:[%s4911_s5 + $0x2d0] sm:$0xff] }
 0x5f3   : > { %v1199_v51 = vpop.xlane.xlu2 %1198 }
 0x5f4   : > { %v1207_v54 = vmul.f32 %v5046_v50, %v1199_v51  ;;  %v2330_v51 = vsel %vm849_vm2, %v4374_v46, 0 }
 0x5f5   : > { %2634 = vmatpush.bf16.xpose.msra.mxu3 %v2330_v51  ;;  %v2384_v51 = vsel %vm849_vm2, %v4392_v44, 0  ;;  %v4432_v44 = vld [vmem:[%s4911_s5 + $0x378] sm:$0xff] }
 0x5f6   : > { %v5053_v57 = vsub.f32 %v1194_v13, %v1207_v54  ;;  %v4330_v13 = vld [vmem:[%s4911_s5 + $0x48] sm:$0xff]  ;;  %v4365_v54 = vld [vmem:[%s4911_s5 + $0x160] sm:$0xff] }
 0x5f7   : > { %v2198_v17 = vsel %vm849_vm2, %v4330_v13, 0  ;;  %v2303_v59 = vsel %vm849_vm2, %v4365_v54, 0  ;;  %v2345_v13 = vsel %vm849_vm2, %v4379_v9, 0  ;;  %v4391_v54 = vld [vmem:[%s4911_s5 + $0x230] sm:$0xff]  ;;  %v4405_v9 = vld [vmem:[%s4911_s5 + $0x2a0] sm:$0xff] }
 0x5f8   : > { %v1209_v60 = vmul.f32 %v5053_v57, %v5053_v57  ;;  %2573 = vmatpush.bf16.xpose.msrb.mxu2 %v2198_v17  ;;  %2650 = vmatpush.bf16.xpose.msra.mxu0 %v2345_v13  ;;  %v4378_v17 = vld [vmem:[%s4911_s5 + $0x1c8] sm:$0xff]  ;;  %v2423_v13 = vsel %vm849_vm2, %v4405_v9, 0 }
 0x5f9   : > { %v2342_v21 = vsel %vm849_vm2, %v4378_v17, 0  ;;  %v4404_v17 = vld [vmem:[%s4911_s5 + $0x298] sm:$0xff] }
 0x5fa   : > { %v1210_v63 = vsel %vm849_vm2, %v1209_v60, 0.0  ;;  %v2327_v60 = vsel %vm849_vm2, %v4373_v55, 0  ;;  %v4399_v55 = vld [vmem:[%s4911_s5 + $0x270] sm:$0xff] }
 0x5fb   : > { %1211 = vadd.xlane.f32.xlu1 %v1210_v63  ;;  %v4364_v63 = vld [vmem:[%s4911_s5 + $0x158] sm:$0xff] }
 0x5fc   : > { %v2300_v3 = vsel %vm849_vm2, %v4364_v63, 0  ;;  %v4390_v63 = vld [vmem:[%s4911_s5 + $0x228] sm:$0xff] }
 0x5fd   : > { %2635 = vmatpush.bf16.xpose.msra.mxu3 %v2327_v60  ;;  %v2405_v60 = vsel %vm849_vm2, %v4399_v55, 0  ;;  %v2528_v55 = vsel %vm849_vm2, %v4440_v45, 0  ;;  %v4441_v45 = vld [vmem:[%s4911_s5 + $0x3c0] sm:$0xff] }
 0x600   : > { %2574 = vmatpush.bf16.xpose.msrb.mxu2 %v2195_v29  ;;  %2651 = vmatpush.bf16.xpose.msra.mxu0 %v2342_v21  ;;  %v2339_v29 = vsel %vm849_vm2, %v4377_v25, 0  ;;  %v2420_v21 = vsel %vm849_vm2, %v4404_v17, 0  ;;  %v4403_v25 = vld [vmem:[%s4911_s5 + $0x290] sm:$0xff] }
 0x605   : > { %2636 = vmatpush.bf16.xpose.msra.mxu3 %v2324_v4  ;;  %v2402_v4 = vsel %vm849_vm2, %v4398_v0, 0 }
 0x608   : > { %2619 = vmatpush.bf16.xpose.msra.mxu2 %v2312_v33  ;;  %2652 = vmatpush.bf16.xpose.msra.mxu0 %v2339_v29  ;;  %v2417_v29 = vsel %vm849_vm2, %v4403_v25, 0 }
 0x60d   : > { %2637 = vmatpush.bf16.xpose.msra.mxu3 %v2321_v12  ;;  %v2399_v12 = vsel %vm849_vm2, %v4397_v8, 0 }
 0x610   : > { %2620 = vmatpush.bf16.xpose.msra.mxu2 %v2309_v38  ;;  %v4574_v38 = vld [vmem:[%s5590_s23] ss:$0 sm:$0xff] }
 0x615   : > { %2638 = vmatpush.bf16.xpose.msra.mxu3 %v2318_v20  ;;  %v2396_v20 = vsel %vm849_vm2, %v4396_v16, 0 }
 0x618   : > { %2621 = vmatpush.bf16.xpose.msra.mxu2 %v2306_v49 }
 0x61d   : > { %2639 = vmatpush.bf16.xpose.msra.mxu3 %v2315_v28  ;;  %v2393_v28 = vsel %vm849_vm2, %v4395_v24, 0 }
 0x620   : > { %2622 = vmatpush.bf16.xpose.msra.mxu2 %v2303_v59  ;;  %v2381_v59 = vsel %vm849_vm2, %v4391_v54, 0  ;;  %v2504_v54 = vsel %vm849_vm2, %v4432_v44, 0  ;;  %v4433_v44 = vld [vmem:[%s4911_s5 + $0x380] sm:$0xff] }
 0x628   : > { %2623 = vmatpush.bf16.xpose.msra.mxu2 %v2300_v3  ;;  %v2378_v3 = vsel %vm849_vm2, %v4390_v63, 0 }
 0x630   : > { %2624 = vmatpush.bf16.xpose.msra.mxu2 %v2297_v11  ;;  %v2375_v11 = vsel %vm849_vm2, %v4389_v7, 0 }
 0x638   : > { %2625 = vmatpush.bf16.xpose.msra.mxu2 %v2294_v19  ;;  %v2372_v19 = vsel %vm849_vm2, %v4388_v15, 0 }
 0x640   : > { %2626 = vmatpush.bf16.xpose.msra.mxu2 %v2291_v27  ;;  %v2369_v27 = vsel %vm849_vm2, %v4387_v22, 0 }
 0x66e   : > { %v1212_v30 = vpop.xlane.xlu1 %1211 }
 0x66f   : > { %v1213_v31 = vmul.f32 %v1212_v30, %v5046_v50  ;;  %v2441_v30 = vsel %vm849_vm2, %v4411_v26, 0  ;;  %v4419_v26 = vld [vmem:[%s4911_s5 + $0x310] sm:$0xff] }
 0x671   : > { %v1214_v32 = vadd.f32 1e-05, %v1213_v31  ;;  %v4386_v31 = vld [vmem:[%s4911_s5 + $0x208] sm:$0xff] }
 0x673   : > { %4596 = vrsqrt.f32 %v1214_v32  ;;  %vm1221_vm9 = vweird.f32 %v1214_v32 }
 0x679   : > { %v4597_v33 = vpop.eup %4596 }
 0x67a   : > { %v1216_v34 = vmul.f32 %v4597_v33, %v1214_v32  ;;  %vm1222_vm8 = vweird.f32 %v4597_v33  ;;  %v4394_v32 = vld [vmem:[%s4911_s5 + $0x248] sm:$0xff] }
 0x67b   : > { %vm1223_vm10 = vmor %vm1221_vm9, %vm1222_vm8 }
 0x67c   : > { %v1217_v35 = vmul.f32 %v4597_v33, %v1216_v34  ;;  %v4410_v34 = vld [vmem:[%s4911_s5 + $0x2c8] sm:$0xff] }
 0x67e   : > { %v1218_v36 = vmul.f32 0.5, %v1217_v35  ;;  %v2366_v35 = vsel %vm849_vm2, %v4386_v31, 0 }
 0x680   : > { %v1219_v37 = vsub.f32 1.5, %v1218_v36  ;;  %v2390_v36 = vsel %vm849_vm2, %v4394_v32, 0 }
 0x682   : > { %v1220_v39 = vmul.f32 %v4597_v33, %v1219_v37 }
 0x684   : > { %v1224_v41 = vsel %vm1223_vm10, %v4597_v33, %v1220_v39  ;;  %v4402_v33 = vld [vmem:[%s4911_s5 + $0x288] sm:$0xff]  ;;  %v2438_v39 = vsel %vm849_vm2, %v4410_v34, 0 }
 0x685   : > { %v1225_v42 = vmul.f32 %v1224_v41, %v5053_v57  ;;  %v2432_v57 = vsel %vm849_vm2, %v4408_v47, 0  ;;  %v2414_v37 = vsel %vm849_vm2, %v4402_v33, 0  ;;  %v4393_v41 = vld [vmem:[%s4911_s5 + $0x240] sm:$0xff]  ;;  %v4448_v47 = vld [vmem:[%s4911_s5 + $0x3f8] sm:$0xff]  ;;  %v4418_v34 = vld [vmem:[%s4911_s5 + $0x308] sm:$0xff] }
 0x686   : > { %v2552_v56 = vsel %vm849_vm2, %v4448_v47, 0  ;;  %v4208_v47 = vld [vmem:[%s4926_s17 + $0x80] sm:$0xf] }
 0x687   : > { %v1229_v43 = vmul.f32 %v4573_v40, %v1225_v42  ;;  %v4385_v40 = vld [vmem:[%s4911_s5 + $0x200] sm:$0xff] }
 0x688   : > { %v4409_v42 = vld [vmem:[%s4911_s5 + $0x2c0] sm:$0xff]  ;;  %v2363_v48 = vsel %vm849_vm2, %v4385_v40, 0 }
 0x689   : > { %v5168_v46 = vadd.f32 %v4574_v38, %v1229_v43  ;;  %v4401_v38 = vld [vmem:[%s4911_s5 + $0x280] sm:$0xff]  ;;  %v4424_v43 = vld [vmem:[%s4911_s5 + $0x338] sm:$0xff] }
 0x68b   : > { %v5174_v49 = vpack.c.bf16 %v5168_v46, %v5168_v46 }
 0x68d   : > { %4126 = vmatmul.msk.bf16.vlgmr.msrb.gmra.mxu1 %vm849_vm2, %v5174_v49  ;;  %4127 = vmatmul.msk.bf16.vlgmr.msrb.gmra.mxu2 %vm849_vm2, %v5174_v49 }
 0x68e   : > { %4128 = vmatmul.msk.bf16.vlgmr.msrb.gmra.mxu3 %vm849_vm2, %v5174_v49  ;;  %4129 = vmatmul.msk.bf16.vlgmr.msrb.gmra.mxu0 %vm849_vm2, %v5174_v49 }
 0x68f   : > { %2658 = vmatpush.bf16.xpose.msrb.mxu1 %v2384_v51  ;;  %2671 = vmatpush.bf16.xpose.msrb.mxu2 %v2408_v52  ;;  %v2387_v51 = vsel %vm849_vm2, %v4393_v41, 0  ;;  %v2411_v52 = vsel %vm849_vm2, %v4401_v38, 0 }
 0x690   : > { %2684 = vmatpush.bf16.xpose.msrb.mxu3 %v2432_v57  ;;  %2697 = vmatpush.bf16.xpose.msrb.mxu0 %v2456_v53  ;;  %v2435_v57 = vsel %vm849_vm2, %v4409_v42, 0  ;;  %v2480_v53 = vsel %vm849_vm2, %v4424_v43, 0  ;;  %v4417_v42 = vld [vmem:[%s4911_s5 + $0x300] sm:$0xff] }
 0x691   : > { %v4425_v43 = vld [vmem:[%s4911_s5 + $0x340] sm:$0xff] }
 0x697   : > { %2659 = vmatpush.bf16.xpose.msrb.mxu1 %v2381_v59  ;;  %2672 = vmatpush.bf16.xpose.msrb.mxu2 %v2405_v60  ;;  %v4431_v59 = vld [vmem:[%s4911_s5 + $0x370] sm:$0xff] }
 0x698   : > { %2685 = vmatpush.bf16.xpose.msrb.mxu3 %v2429_v61  ;;  %2698 = vmatpush.bf16.xpose.msrb.mxu0 %v2453_v62  ;;  %v4439_v60 = vld [vmem:[%s4911_s5 + $0x3b0] sm:$0xff]  ;;  %v2477_v62 = vsel %vm849_vm2, %v4423_v58, 0  ;;  %v2501_v63 = vsel %vm849_vm2, %v4431_v59, 0  ;;  %v2483_v58 = vsel %vm849_vm2, %v4425_v43, 0  ;;  %v2507_v59 = vsel %vm849_vm2, %v4433_v44, 0 }
 0x699   : > { %v4447_v61 = vld [vmem:[%s4911_s5 + $0x3f0] sm:$0xff]  ;;  %v2525_v0 = vsel %vm849_vm2, %v4439_v60, 0  ;;  %v2531_v60 = vsel %vm849_vm2, %v4441_v45, 0 }
 0x69a   : > { %v2549_v1 = vsel %vm849_vm2, %v4447_v61, 0 }
 0x69d   : > { %4130 = vmatmul.msk.bf16.vlgmr.msra.gmra.mxu1 %vm849_vm2, %v5174_v49  ;;  %4131 = vmatmul.msk.bf16.vlgmr.msra.gmra.mxu2 %vm849_vm2, %v5174_v49 }
 0x69e   : > { %4132 = vmatmul.msk.bf16.vlgmr.msra.gmra.mxu3 %vm849_vm2, %v5174_v49  ;;  %4133 = vmatmul.msk.bf16.vlgmr.msra.gmra.mxu0 %vm849_vm2, %v5174_v49 }
 0x69f   : > { %2660 = vmatpush.bf16.xpose.msrb.mxu1 %v2378_v3  ;;  %2673 = vmatpush.bf16.xpose.msrb.mxu2 %v2402_v4  ;;  %v4430_v3 = vld [vmem:[%s4911_s5 + $0x368] sm:$0xff] }
 0x6a0   : > { %2686 = vmatpush.bf16.xpose.msrb.mxu3 %v2426_v5  ;;  %2699 = vmatpush.bf16.xpose.msrb.mxu0 %v2450_v6  ;;  %v4438_v4 = vld [vmem:[%s4911_s5 + $0x3a8] sm:$0xff]  ;;  %v2474_v6 = vsel %vm849_vm2, %v4422_v2, 0  ;;  %v2498_v7 = vsel %vm849_vm2, %v4430_v3, 0  ;;  %v4457_v2 = vld [vmem:[%s4926_s17 + $0x3c] sm:$0xf0] }
 0x6a1   : > { %v4446_v5 = vld [vmem:[%s4911_s5 + $0x3e8] sm:$0xff]  ;;  %v2522_v8 = vsel %vm849_vm2, %v4438_v4, 0 }
 0x6a2   : > { %v2546_v9 = vsel %vm849_vm2, %v4446_v5, 0  ;;  %v4450_v3 = vld [vmem:[%s4926_s17 + $0xc] sm:$0xf]  ;;  %v4449_v5 = vld [vmem:[%s4926_s17 + $0x4] sm:$0xf] }
 0x6a3   : > { %v4154_v4 = vld [vmem:[%s4926_s17 + $0x48] sm:$0xf0] }
 0x6a7   : > { %2661 = vmatpush.bf16.xpose.msrb.mxu1 %v2375_v11  ;;  %2674 = vmatpush.bf16.xpose.msrb.mxu2 %v2399_v12  ;;  %v4429_v11 = vld [vmem:[%s4911_s5 + $0x360] sm:$0xff] }
 0x6a8   : > { %2687 = vmatpush.bf16.xpose.msrb.mxu3 %v2423_v13  ;;  %2700 = vmatpush.bf16.xpose.msrb.mxu0 %v2447_v14  ;;  %v4437_v12 = vld [vmem:[%s4911_s5 + $0x3a0] sm:$0xff]  ;;  %v2471_v14 = vsel %vm849_vm2, %v4421_v10, 0  ;;  %v2495_v15 = vsel %vm849_vm2, %v4429_v11, 0  ;;  %v4224_v10 = vld [vmem:[%s4926_s17 + $0x90] sm:$0xf] }
 0x6a9   : > { %v4445_v13 = vld [vmem:[%s4911_s5 + $0x3e0] sm:$0xff]  ;;  %v2519_v16 = vsel %vm849_vm2, %v4437_v12, 0  ;;  %v4475_v11 = vld [vmem:[%s4926_s17 + $0xcc] sm:$0xf0]  ;;  %v4468_v12 = vld [vmem:[%s4926_s17 + $0x9c] sm:$0xf] }
 0x6aa   : > { %v2543_v17 = vsel %vm849_vm2, %v4445_v13, 0  ;;  %v4234_v13 = vld [vmem:[%s4926_s17 + $0xd8] sm:$0xf0] }
 0x6af   : > { %2662 = vmatpush.bf16.xpose.msrb.mxu1 %v2372_v19  ;;  %2675 = vmatpush.bf16.xpose.msrb.mxu2 %v2396_v20  ;;  %v4428_v19 = vld [vmem:[%s4911_s5 + $0x358] sm:$0xff] }
 0x6b0   : > { %2688 = vmatpush.bf16.xpose.msrb.mxu3 %v2420_v21  ;;  %2701 = vmatpush.bf16.xpose.msrb.mxu0 %v2444_v23  ;;  %v4436_v20 = vld [vmem:[%s4911_s5 + $0x398] sm:$0xff]  ;;  %v2468_v23 = vsel %vm849_vm2, %v4420_v18, 0  ;;  %v2492_v22 = vsel %vm849_vm2, %v4428_v19, 0 }
 0x6b1   : > { %v4444_v21 = vld [vmem:[%s4911_s5 + $0x3d8] sm:$0xff]  ;;  %v2516_v24 = vsel %vm849_vm2, %v4436_v20, 0 }
 0x6b2   : > { %v2540_v25 = vsel %vm849_vm2, %v4444_v21, 0  ;;  %v4232_v18 = vld [vmem:[%s4926_s17 + $0x98] sm:$0xf] }
 0x6b3   : > { %v4476_v19 = vld [vmem:[%s4926_s17 + $0xd4] sm:$0xf0] }
 0x6b7   : > { %2663 = vmatpush.bf16.xpose.msrb.mxu1 %v2369_v27  ;;  %2676 = vmatpush.bf16.xpose.msrb.mxu2 %v2393_v28  ;;  %v4427_v27 = vld [vmem:[%s4911_s5 + $0x350] sm:$0xff] }
 0x6b8   : > { %2689 = vmatpush.bf16.xpose.msrb.mxu3 %v2417_v29  ;;  %2702 = vmatpush.bf16.xpose.msrb.mxu0 %v2441_v30  ;;  %v4435_v28 = vld [vmem:[%s4911_s5 + $0x390] sm:$0xff]  ;;  %v2465_v30 = vsel %vm849_vm2, %v4419_v26, 0  ;;  %v2489_v31 = vsel %vm849_vm2, %v4427_v27, 0  ;;  %v4233_v27 = vor.u32 %v4476_v19, %v4232_v18 }
 0x6b9   : > { %v4443_v29 = vld [vmem:[%s4911_s5 + $0x3d0] sm:$0xff]  ;;  %v2513_v32 = vsel %vm849_vm2, %v4435_v28, 0 }
 0x6ba   : > { %v2537_v33 = vsel %vm849_vm2, %v4443_v29, 0 }
 0x6bf   : > { %2664 = vmatpush.bf16.xpose.msrb.mxu1 %v2366_v35  ;;  %2677 = vmatpush.bf16.xpose.msrb.mxu2 %v2390_v36  ;;  %v4426_v35 = vld [vmem:[%s4911_s5 + $0x348] sm:$0xff] }
 0x6c0   : > { %2690 = vmatpush.bf16.xpose.msrb.mxu3 %v2414_v37  ;;  %2703 = vmatpush.bf16.xpose.msrb.mxu0 %v2438_v39  ;;  %v4434_v36 = vld [vmem:[%s4911_s5 + $0x388] sm:$0xff]  ;;  %v2462_v39 = vsel %vm849_vm2, %v4418_v34, 0  ;;  %v2486_v40 = vsel %vm849_vm2, %v4426_v35, 0  ;;  %v4452_v34 = vld [vmem:[%s4926_s17 + $0x1c] sm:$0xf] }
 0x6c1   : > { %v4442_v37 = vld [vmem:[%s4911_s5 + $0x3c8] sm:$0xff]  ;;  %v2510_v41 = vsel %vm849_vm2, %v4434_v36, 0  ;;  %v4170_v35 = vld [vmem:[%s4926_s17 + $0x58] sm:$0xf0]  ;;  %v4451_v36 = vld [vmem:[%s4926_s17 + $0x14] sm:$0xf] }
 0x6c2   : > { %v2534_v38 = vsel %vm849_vm2, %v4442_v37, 0  ;;  %v4173_v45 = vor.u32 %v4452_v34, %v4170_v35  ;;  %v4176_v35 = vld [vmem:[%s4926_s17 + $0x20] sm:$0xf] }
 0x6c7   : > { %2665 = vmatpush.bf16.xpose.msrb.mxu1 %v2363_v48  ;;  %2678 = vmatpush.bf16.xpose.msrb.mxu2 %v2387_v51  ;;  %v4473_v48 = vld [vmem:[%s4926_s17 + $0xbc] sm:$0xf0]  ;;  %v4466_v51 = vld [vmem:[%s4926_s17 + $0x8c] sm:$0xf] }
 0x6c8   : > { %2691 = vmatpush.bf16.xpose.msrb.mxu3 %v2411_v52  ;;  %2704 = vmatpush.bf16.xpose.msrb.mxu0 %v2435_v57  ;;  %v4218_v52 = vld [vmem:[%s4926_s17 + $0xc8] sm:$0xf0]  ;;  %v4465_v57 = vld [vmem:[%s4926_s17 + $0x84] sm:$0xf]  ;;  %v4209_v61 = vor.u32 %v4473_v48, %v4208_v47  ;;  %v4240_v47 = vld [vmem:[%s4926_s17 + $0xa0] sm:$0xf] }
 0x6c9   : > { %v4477_v48 = vld [vmem:[%s4926_s17 + $0xdc] sm:$0xf0] }
 0x6ce   : > { %4134 = vmatmul.msk.bf16.vlgmr.msrb.gmra.mxu1 %vm849_vm2, %v5174_v49  ;;  %4135 = vmatmul.msk.bf16.vlgmr.msrb.gmra.mxu2 %vm849_vm2, %v5174_v49 }
 0x6cf   : > { %2710 = vmatpush.bf16.xpose.msra.mxu1 %v2480_v53  ;;  %2723 = vmatpush.bf16.xpose.msra.mxu2 %v2504_v54  ;;  %v4210_v53 = vld [vmem:[%s4926_s17 + $0xc0] sm:$0xf0]  ;;  %v4216_v54 = vld [vmem:[%s4926_s17 + $0x88] sm:$0xf] }
 0x6d0   : > { %2736 = vmatpush.bf16.xpose.msra.mxu3 %v2528_v55  ;;  %2749 = vmatpush.bf16.xpose.msra.mxu0 %v2552_v56  ;;  %v4474_v55 = vld [vmem:[%s4926_s17 + $0xc4] sm:$0xf0]  ;;  %v2459_v56 = vsel %vm849_vm2, %v4417_v42, 0 }
 0x6d1   : > { %4136 = vmatmul.msk.bf16.vlgmr.msrb.gmra.mxu3 %vm849_vm2, %v5174_v49  ;;  %4137 = vmatmul.msk.bf16.vlgmr.msrb.gmra.mxu0 %vm849_vm2, %v5174_v49 }
 0x6d7   : > { %2711 = vmatpush.bf16.xpose.msra.mxu1 %v2477_v62  ;;  %2724 = vmatpush.bf16.xpose.msra.mxu2 %v2501_v63  ;;  %v4221_v62 = vor.u32 %v4466_v51, %v4218_v52  ;;  %v4213_v63 = vor.u32 %v4465_v57, %v4210_v53 }
 0x6d8   : > { %2737 = vmatpush.bf16.xpose.msra.mxu3 %v2525_v0  ;;  %2750 = vmatpush.bf16.xpose.msra.mxu0 %v2549_v1  ;;  %v4217_v0 = vor.u32 %v4474_v55, %v4216_v54  ;;  %v4144_v1 = vld [vmem:[%s4926_s17] sm:$0xf]  ;;  %v4470_v55 = vld [vmem:[%s4926_s17 + $0xac] sm:$0xf] }
 0x6df   : > { %2712 = vmatpush.bf16.xpose.msra.mxu1 %v2474_v6  ;;  %2725 = vmatpush.bf16.xpose.msra.mxu2 %v2498_v7  ;;  %v4146_v6 = vld [vmem:[%s4926_s17 + $0x40] sm:$0xf0]  ;;  %v4152_v7 = vld [vmem:[%s4926_s17 + $0x8] sm:$0xf] }
 0x6e0   : > { %2738 = vmatpush.bf16.xpose.msra.mxu3 %v2522_v8  ;;  %2751 = vmatpush.bf16.xpose.msra.mxu0 %v2546_v9  ;;  %v5340_v8 = vld [vmem:[%s4916_s7] sm:$0xff]  ;;  %v4458_v9 = vld [vmem:[%s4926_s17 + $0x44] sm:$0xf0]  ;;  %v4149_v20 = vor.u32 %v4449_v5, %v4146_v6 }
 0x6e1   : > { %v4153_v21 = vor.u32 %v4458_v9, %v4152_v7  ;;  %v1498_v28 = vperm.slane %v5340_v8, 3  ;;  %v1501_v19 = vperm.slane %v5340_v8, 6 }
 0x6e7   : > { %2713 = vmatpush.bf16.xpose.msra.mxu1 %v2471_v14  ;;  %2726 = vmatpush.bf16.xpose.msra.mxu2 %v2495_v15  ;;  %v4467_v14 = vld [vmem:[%s4926_s17 + $0x94] sm:$0xf]  ;;  %v4145_v15 = vor.u32 %v4457_v2, %v4144_v1  ;;  %v4478_v1 = vld [vmem:[%s4926_s17 + $0xe4] sm:$0xf0] }
 0x6e8   : > { %2739 = vmatpush.bf16.xpose.msra.mxu3 %v2519_v16  ;;  %2752 = vmatpush.bf16.xpose.msra.mxu0 %v2543_v17  ;;  %v4157_v16 = vor.u32 %v4450_v3, %v4154_v4  ;;  %v4226_v17 = vld [vmem:[%s4926_s17 + $0xd0] sm:$0xf0]  ;;  %v4241_v3 = vor.u32 %v4477_v48, %v4240_v47  ;;  %v4256_v48 = vld [vmem:[%s4926_s17 + $0xb0] sm:$0xf] }
 0x6e9   : > { %v4229_v26 = vor.u32 %v4467_v14, %v4226_v17  ;;  %v1500_v17 = vperm.slane %v5340_v8, 5 }
 0x6ef   : > { %2714 = vmatpush.bf16.xpose.msra.mxu1 %v2468_v23  ;;  %2727 = vmatpush.bf16.xpose.msra.mxu2 %v2492_v22  ;;  %v4225_v23 = vor.u32 %v4475_v11, %v4224_v10  ;;  %v4237_v22 = vor.u32 %v4468_v12, %v4234_v13  ;;  %v1499_v13 = vperm.slane %v5340_v8, 4 }
 0x6f0   : > { %2740 = vmatpush.bf16.xpose.msra.mxu3 %v2516_v24  ;;  %2753 = vmatpush.bf16.xpose.msra.mxu0 %v2540_v25  ;;  %v1495_v24 = vperm.slane %v5340_v8, 0 }
 0x6f7   : > { %2715 = vmatpush.bf16.xpose.msra.mxu1 %v2465_v30  ;;  %2728 = vmatpush.bf16.xpose.msra.mxu2 %v2489_v31  ;;  %v1497_v30 = vperm.slane %v5340_v8, 2  ;;  %v4160_v31 = vld [vmem:[%s4926_s17 + $0x10] sm:$0xf] }
 0x6f8   : > { %2741 = vmatpush.bf16.xpose.msra.mxu3 %v2513_v32  ;;  %2754 = vmatpush.bf16.xpose.msra.mxu0 %v2537_v33  ;;  %v4459_v32 = vld [vmem:[%s4926_s17 + $0x4c] sm:$0xf0] }
 0x6f9   : > { %v4161_v44 = vor.u32 %v4459_v32, %v4160_v31 }
 0x6ff   : > { %2716 = vmatpush.bf16.xpose.msra.mxu1 %v2462_v39  ;;  %2729 = vmatpush.bf16.xpose.msra.mxu2 %v2486_v40  ;;  %v4162_v39 = vld [vmem:[%s4926_s17 + $0x50] sm:$0xf0]  ;;  %v4168_v40 = vld [vmem:[%s4926_s17 + $0x18] sm:$0xf] }
 0x700   : > { %2742 = vmatpush.bf16.xpose.msra.mxu3 %v2510_v41  ;;  %2755 = vmatpush.bf16.xpose.msra.mxu0 %v2534_v38  ;;  %v4460_v41 = vld [vmem:[%s4926_s17 + $0x54] sm:$0xf0]  ;;  %v4165_v53 = vor.u32 %v4451_v36, %v4162_v39  ;;  %v4461_v36 = vld [vmem:[%s4926_s17 + $0x5c] sm:$0xf0] }
 0x701   : > { %v4169_v54 = vor.u32 %v4460_v41, %v4168_v40  ;;  %v4177_v39 = vor.u32 %v4461_v36, %v4176_v35  ;;  %v4186_v40 = vld [vmem:[%s4926_s17 + $0x68] sm:$0xf0] }
 0x707   : > { %2717 = vmatpush.bf16.xpose.msra.mxu1 %v2459_v56  ;;  %2730 = vmatpush.bf16.xpose.msra.mxu2 %v2483_v58  ;;  %v4250_v56 = vld [vmem:[%s4926_s17 + $0xe8] sm:$0xf0] }
 0x708   : > { %2743 = vmatpush.bf16.xpose.msra.mxu3 %v2507_v59  ;;  %2756 = vmatpush.bf16.xpose.msra.mxu0 %v2531_v60  ;;  %v4253_v6 = vor.u32 %v4470_v55, %v4250_v56  ;;  %v4258_v55 = vld [vmem:[%s4926_s17 + $0xf0] sm:$0xf0] }
 0x70a   : > { %v2563_v25 = vpop.f32.mrf.mxu1 }
 0x70b   : > { %v2602_v29 = vpop.f32.mrf.mxu0  ;;  %v2564_v33 = vadd.f32 %v2563_v25, %v1495_v24 }
 0x70c   : > { %v2603_v37 = vadd.f32 %v2602_v29, %v1498_v28 }
 0x70d   : > { %v2762_v51 = vmax.f32 %v2564_v33, 0.0 }
 0x70e   : > { %4138 = vmatmul.msk.bf16.vlgmr.msra.gmra.mxu1 %vm849_vm2, %v5174_v49  ;;  %4139 = vmatmul.msk.bf16.vlgmr.msra.gmra.mxu2 %vm849_vm2, %v5174_v49  ;;  %v2765_v58 = vmax.f32 %v2603_v37, 0.0  ;;  %v4454_v37 = vld [vmem:[%s4926_s17 + $0x2c] sm:$0xf] }
 0x70f   : > { %2996 = vmatpush.bf16.xpose.msrb.mxu1 %v4209_v61  ;;  %3009 = vmatpush.bf16.xpose.msrb.mxu2 %v4213_v63  ;;  %v4469_v61 = vld [vmem:[%s4926_s17 + $0xa4] sm:$0xf]  ;;  %v2778_v4 = vpack.c.bf16 %v2762_v51, %v2762_v51  ;;  %v4189_v41 = vor.u32 %v4454_v37, %v4186_v40  ;;  %v4479_v51 = vld [vmem:[%s4926_s17 + $0xec] sm:$0xf0] }
 0x710   : > { %3035 = vmatpush.bf16.xpose.msrb.mxu0 %v4221_v62  ;;  %3022 = vmatpush.bf16.xpose.msrb.mxu3 %v4217_v0  ;;  %v2576_v38 = vpop.f32.mrf.mxu2  ;;  %v4242_v62 = vld [vmem:[%s4926_s17 + $0xe0] sm:$0xf0]  ;;  %v4248_v0 = vld [vmem:[%s4926_s17 + $0xa8] sm:$0xf]  ;;  %v2781_v7 = vpack.c.bf16 %v2765_v58, %v2765_v58 }
 0x711   : > { %4140 = vmatmul.msk.bf16.vlgmr.msra.gmra.mxu3 %vm849_vm2, %v5174_v49  ;;  %4141 = vmatmul.msk.bf16.vlgmr.msra.gmra.mxu0 %vm849_vm2, %v5174_v49  ;;  %v1496_v49 = vperm.slane %v5340_v8, 1  ;;  %v2589_v43 = vpop.f32.mrf.mxu3  ;;  %v4245_v9 = vor.u32 %v4469_v61, %v4242_v62  ;;  %v4249_v10 = vor.u32 %v4478_v1, %v4248_v0  ;;  %v1492_v62 = vld [vmem:[%s4916_s7 + $0x8] sm:$0xff] }
 0x712   : > { %v2590_v52 = vadd.f32 %v2589_v43, %v1497_v30  ;;  %v2565_v57 = vpop.f32.mrf.mxu1  ;;  %v4184_v43 = vld [vmem:[%s4926_s17 + $0x28] sm:$0xf]  ;;  %v1506_v0 = vperm.slane %v1492_v62, 3  ;;  %v1510_v35 = vperm.slane %v1492_v62, 7 }
 0x713   : > { %v2577_v42 = vadd.f32 %v2576_v38, %v1496_v49  ;;  %v2604_v60 = vpop.f32.mrf.mxu0  ;;  %v4453_v38 = vld [vmem:[%s4926_s17 + $0x24] sm:$0xf]  ;;  %v4257_v57 = vor.u32 %v4479_v51, %v4256_v48 }
 0x714   : > { %v2764_v63 = vmax.f32 %v2590_v52, 0.0  ;;  %v4472_v52 = vld [vmem:[%s4926_s17 + $0xbc] sm:$0xf]  ;;  %v4480_v60 = vld [vmem:[%s4926_s17 + $0xf4] sm:$0xf0] }
 0x715   : > { %v2763_v59 = vmax.f32 %v2577_v42, 0.0  ;;  %v4178_v42 = vld [vmem:[%s4926_s17 + $0x60] sm:$0xf0] }
 0x716   : > { %v2780_v5 = vpack.c.bf16 %v2764_v63, %v2764_v63  ;;  %v1503_v63 = vperm.slane %v1492_v62, 0 }
 0x717   : > { %2997 = vmatpush.bf16.xpose.msrb.mxu1 %v4145_v15  ;;  %3010 = vmatpush.bf16.xpose.msrb.mxu2 %v4149_v20  ;;  %v2779_v2 = vpack.c.bf16 %v2763_v59, %v2763_v59  ;;  %v1502_v15 = vperm.slane %v5340_v8, 7  ;;  %v4264_v59 = vld [vmem:[%s4926_s17 + $0xb8] sm:$0xf] }
 0x718   : > { %3036 = vmatpush.bf16.xpose.msrb.mxu0 %v4157_v16  ;;  %3023 = vmatpush.bf16.xpose.msrb.mxu3 %v4153_v21  ;;  %v2578_v11 = vpop.f32.mrf.mxu2  ;;  %v4265_v61 = vor.u32 %v4480_v60, %v4264_v59 }
 0x719   : > { %v2591_v12 = vpop.f32.mrf.mxu3 }
 0x71a   : > { %v2615_v14 = vpop.f32.mrf.mxu1 }
 0x71b   : > { %v2654_v16 = vpop.f32.mrf.mxu0  ;;  %v2616_v18 = vadd.f32 %v2615_v14, %v1499_v13 }
 0x71c   : > { %v2655_v20 = vadd.f32 %v2654_v16, %v1502_v15 }
 0x71d   : > { %v2766_v24 = vmax.f32 %v2616_v18, 0.0 }
 0x71e   : > { %2998 = vmatmul.bf16.vlgmr.msrb.gmra.mxu1 %v2778_v4  ;;  %3011 = vmatmul.bf16.vlgmr.msrb.gmra.mxu2 %v2779_v2 }
 0x71f   : > { %3048 = vmatpush.bf16.xpose.msra.mxu1 %v4225_v23  ;;  %3061 = vmatpush.bf16.xpose.msra.mxu2 %v4229_v26  ;;  %v2782_v31 = vpack.c.bf16 %v2766_v24, %v2766_v24  ;;  %v4192_v24 = vld [vmem:[%s4926_s17 + $0x30] sm:$0xf] }
 0x720   : > { %3087 = vmatpush.bf16.xpose.msra.mxu0 %v4237_v22  ;;  %3074 = vmatpush.bf16.xpose.msra.mxu3 %v4233_v27  ;;  %v2628_v21 = vpop.f32.mrf.mxu2  ;;  %v2769_v27 = vmax.f32 %v2655_v20, 0.0 }
 0x721   : > { %3037 = vmatmul.bf16.vlgmr.msrb.gmra.mxu0 %v2781_v7  ;;  %3024 = vmatmul.bf16.vlgmr.msrb.gmra.mxu3 %v2780_v5  ;;  %v2629_v23 = vadd.f32 %v2628_v21, %v1500_v17  ;;  %v2641_v22 = vpop.f32.mrf.mxu3 }
 0x722   : > { %v2642_v25 = vadd.f32 %v2641_v22, %v1501_v19  ;;  %v2617_v26 = vpop.f32.mrf.mxu1  ;;  %v2785_v8 = vpack.c.bf16 %v2769_v27, %v2769_v27 }
 0x723   : > { %v2767_v28 = vmax.f32 %v2629_v23, 0.0  ;;  %v2656_v29 = vpop.f32.mrf.mxu0  ;;  %v4456_v26 = vld [vmem:[%s4926_s17 + $0x3c] sm:$0xf] }
 0x724   : > { %v2768_v49 = vmax.f32 %v2642_v25, 0.0  ;;  %v4463_v25 = vld [vmem:[%s4926_s17 + $0x6c] sm:$0xf0] }
 0x725   : > { %v2783_v30 = vpack.c.bf16 %v2767_v28, %v2767_v28  ;;  %v4193_v27 = vor.u32 %v4463_v25, %v4192_v24  ;;  %v4202_v28 = vld [vmem:[%s4926_s17 + $0x78] sm:$0xf0] }
 0x726   : > { %v2784_v32 = vpack.c.bf16 %v2768_v49, %v2768_v49  ;;  %v4205_v29 = vor.u32 %v4456_v26, %v4202_v28  ;;  %v4455_v49 = vld [vmem:[%s4926_s17 + $0x34] sm:$0xf] }
 0x727   : > { %3049 = vmatpush.bf16.xpose.msra.mxu1 %v4161_v44  ;;  %3062 = vmatpush.bf16.xpose.msra.mxu2 %v4165_v53  ;;  %v4181_v44 = vor.u32 %v4453_v38, %v4178_v42  ;;  %v4266_v53 = vld [vmem:[%s4926_s17 + $0xf8] sm:$0xf0]  ;;  %v1508_v38 = vperm.slane %v1492_v62, 5 }
 0x728   : > { %3088 = vmatpush.bf16.xpose.msra.mxu0 %v4173_v45  ;;  %3075 = vmatpush.bf16.xpose.msra.mxu3 %v4169_v54  ;;  %v2630_v33 = vpop.f32.mrf.mxu2  ;;  %v4462_v45 = vld [vmem:[%s4926_s17 + $0x64] sm:$0xf0]  ;;  %v4471_v54 = vld [vmem:[%s4926_s17 + $0xb4] sm:$0xf]  ;;  %v4269_v56 = vor.u32 %v4472_v52, %v4266_v53 }
 0x729   : > { %v2643_v34 = vpop.f32.mrf.mxu3  ;;  %v4185_v47 = vor.u32 %v4462_v45, %v4184_v43  ;;  %v4261_v58 = vor.u32 %v4471_v54, %v4258_v55  ;;  %v1509_v43 = vperm.slane %v1492_v62, 6 }
 0x72a   : > { %v1507_v34 = vperm.slane %v1492_v62, 4 }
 0x72e   : > { %3050 = vmatmul.bf16.vlgmr.msra.gmra.mxu1 %v2782_v31  ;;  %3063 = vmatmul.bf16.vlgmr.msra.gmra.mxu2 %v2783_v30  ;;  %v4194_v30 = vld [vmem:[%s4926_s17 + $0x70] sm:$0xf0]  ;;  %v4200_v31 = vld [vmem:[%s4926_s17 + $0x38] sm:$0xf] }
 0x72f   : > { %3100 = vmatpush.bf16.xpose.msrb.mxu1 %v4241_v3  ;;  %3113 = vmatpush.bf16.xpose.msrb.mxu2 %v4245_v9  ;;  %v1505_v9 = vperm.slane %v1492_v62, 2 }
 0x730   : > { %3139 = vmatpush.bf16.xpose.msrb.mxu0 %v4253_v6  ;;  %3126 = vmatpush.bf16.xpose.msrb.mxu3 %v4249_v10  ;;  %v1504_v6 = vperm.slane %v1492_v62, 1 }
 0x731   : > { %3089 = vmatmul.bf16.vlgmr.msra.gmra.mxu0 %v2785_v8  ;;  %3076 = vmatmul.bf16.vlgmr.msra.gmra.mxu3 %v2784_v32  ;;  %v4197_v32 = vor.u32 %v4455_v49, %v4194_v30  ;;  %v4464_v8 = vld [vmem:[%s4926_s17 + $0x74] sm:$0xf0]  ;;  %s5591_s17 = scalar_lea.vmem %s5528_s14, %s4874_s24 }
 0x732   : > { %v4201_v33 = vor.u32 %v4464_v8, %v4200_v31  ;;  %v4575_v62 = vld [vmem:[%s5591_s17] ss:$0 sm:$0xff] }
 0x737   : > { %3101 = vmatpush.bf16.xpose.msrb.mxu1 %v4177_v39  ;;  %3114 = vmatpush.bf16.xpose.msrb.mxu2 %v4181_v44 }
 0x738   : > { %3140 = vmatpush.bf16.xpose.msrb.mxu0 %v4189_v41  ;;  %3127 = vmatpush.bf16.xpose.msrb.mxu3 %v4185_v47 }
 0x73f   : > { %3152 = vmatpush.bf16.xpose.msra.mxu1 %v4257_v57  ;;  %3165 = vmatpush.bf16.xpose.msra.mxu2 %v4261_v58 }
 0x740   : > { %3191 = vmatpush.bf16.xpose.msra.mxu0 %v4269_v56  ;;  %3178 = vmatpush.bf16.xpose.msra.mxu3 %v4265_v61 }
 0x747   : > { %3153 = vmatpush.bf16.xpose.msra.mxu1 %v4193_v27  ;;  %3166 = vmatpush.bf16.xpose.msra.mxu2 %v4197_v32 }
 0x748   : > { %3192 = vmatpush.bf16.xpose.msra.mxu0 %v4205_v29  ;;  %3179 = vmatpush.bf16.xpose.msra.mxu3 %v4201_v33 }
 0x74b   : > { %v2667_v1 = vpop.f32.mrf.mxu1 }
 0x74c   : > { %v2668_v2 = vadd.f32 %v2667_v1, %v1503_v63 }
 0x74e   : > { %v2706_v3 = vpop.f32.mrf.mxu0  ;;  %v2770_v5 = vmax.f32 %v2668_v2, 0.0 }
 0x74f   : > { %v2707_v4 = vadd.f32 %v2706_v3, %v1506_v0 }
 0x750   : > { %v2786_v10 = vpack.c.bf16 %v2770_v5, %v2770_v5 }
 0x751   : > { %v2773_v7 = vmax.f32 %v2707_v4, 0.0  ;;  %v2680_v12 = vpop.f32.mrf.mxu2 }
 0x752   : > { %v2681_v13 = vadd.f32 %v2680_v12, %v1504_v6  ;;  %3102 = vmatmul.bf16.vlgmr.msrb.gmra.mxu1 %v2786_v10 }
 0x753   : > { %v2789_v11 = vpack.c.bf16 %v2773_v7, %v2773_v7  ;;  %v2669_v16 = vpop.f32.mrf.mxu1 }
 0x754   : > { %v2693_v14 = vpop.f32.mrf.mxu3  ;;  %v2771_v17 = vmax.f32 %v2681_v13, 0.0 }
 0x755   : > { %v2694_v15 = vadd.f32 %v2693_v14, %v1505_v9  ;;  %3141 = vmatmul.bf16.vlgmr.msrb.gmra.mxu0 %v2789_v11 }
 0x756   : > { %v2708_v18 = vpop.f32.mrf.mxu0  ;;  %v2787_v20 = vpack.c.bf16 %v2771_v17, %v2771_v17 }
 0x757   : > { %v2772_v19 = vmax.f32 %v2694_v15, 0.0 }
 0x758   : > { %3115 = vmatmul.bf16.vlgmr.msrb.gmra.mxu2 %v2787_v20 }
 0x759   : > { %v2788_v21 = vpack.c.bf16 %v2772_v19, %v2772_v19  ;;  %v2682_v23 = vpop.f32.mrf.mxu2 }
 0x75b   : > { %3128 = vmatmul.bf16.vlgmr.msrb.gmra.mxu3 %v2788_v21 }
 0x75c   : > { %v2695_v22 = vpop.f32.mrf.mxu3 }
 0x78b   : > { %v2719_v36 = vpop.f32.mrf.mxu1 }
 0x78c   : > { %v2720_v37 = vadd.f32 %v2719_v36, %v1507_v34 }
 0x78e   : > { %v2758_v39 = vpop.f32.mrf.mxu0  ;;  %v2774_v41 = vmax.f32 %v2720_v37, 0.0 }
 0x78f   : > { %v2759_v40 = vadd.f32 %v2758_v39, %v1510_v35 }
 0x790   : > { %v2790_v44 = vpack.c.bf16 %v2774_v41, %v2774_v41 }
 0x791   : > { %v2777_v42 = vmax.f32 %v2759_v40, 0.0  ;;  %v2732_v47 = vpop.f32.mrf.mxu2 }
 0x792   : > { %v2733_v48 = vadd.f32 %v2732_v47, %v1508_v38  ;;  %3154 = vmatmul.bf16.vlgmr.msra.gmra.mxu1 %v2790_v44 }
 0x793   : > { %v2793_v45 = vpack.c.bf16 %v2777_v42, %v2777_v42  ;;  %v2721_v57 = vpop.f32.mrf.mxu1 }
 0x794   : > { %v2745_v51 = vpop.f32.mrf.mxu3  ;;  %v2775_v53 = vmax.f32 %v2733_v48, 0.0 }
 0x795   : > { %v2746_v52 = vadd.f32 %v2745_v51, %v1509_v43  ;;  %3193 = vmatmul.bf16.vlgmr.msra.gmra.mxu0 %v2793_v45 }
 0x796   : > { %v2760_v54 = vpop.f32.mrf.mxu0  ;;  %v2791_v56 = vpack.c.bf16 %v2775_v53, %v2775_v53 }
 0x797   : > { %v2776_v55 = vmax.f32 %v2746_v52, 0.0 }
 0x798   : > { %3167 = vmatmul.bf16.vlgmr.msra.gmra.mxu2 %v2791_v56 }
 0x799   : > { %v2792_v58 = vpack.c.bf16 %v2776_v55, %v2776_v55  ;;  %v2734_v59 = vpop.f32.mrf.mxu2 }
 0x79b   : > { %3180 = vmatmul.bf16.vlgmr.msra.gmra.mxu3 %v2792_v58  ;;  %v2999_v61 = vpop.f32.mrf.mxu1 }
 0x79c   : > { %v2747_v60 = vpop.f32.mrf.mxu3  ;;  %v3000_v0 = vadd.f32 %v4575_v62, %v2999_v61 }
 0x79e   : > { %v3038_v63 = vpop.f32.mrf.mxu0 }
 0x7a1   : > { %v3012_v1 = vpop.f32.mrf.mxu2 }
 0x7a2   : > { %v3013_v2 = vadd.f32 %v3012_v1, %v3000_v0 }
 0x7a3   : > { %v3001_v4 = vpop.f32.mrf.mxu1 }
 0x7a4   : > { %v3025_v3 = vpop.f32.mrf.mxu3 }
 0x7a5   : > { %v3026_v5 = vadd.f32 %v3025_v3, %v3013_v2 }
 0x7a6   : > { %v3040_v6 = vpop.f32.mrf.mxu0 }
 0x7a7   : > { %v3039_v7 = vadd.f32 %v3038_v63, %v3026_v5  ;;  %v4576_v63 = vld [vmem:[%s747_s25] ss:$0 sm:$0xff] }
 0x7a9   : > { %v3014_v9 = vpop.f32.mrf.mxu2 }
 0x7ab   : > { %v3051_v11 = vpop.f32.mrf.mxu1 }
 0x7ac   : > { %v3027_v10 = vpop.f32.mrf.mxu3  ;;  %v3052_v12 = vadd.f32 %v3051_v11, %v3039_v7 }
 0x7ae   : > { %v3090_v13 = vpop.f32.mrf.mxu0 }
 0x7b1   : > { %v3064_v14 = vpop.f32.mrf.mxu2 }
 0x7b2   : > { %v3065_v15 = vadd.f32 %v3064_v14, %v3052_v12 }
 0x7b3   : > { %v3053_v17 = vpop.f32.mrf.mxu1 }
 0x7b4   : > { %v3077_v16 = vpop.f32.mrf.mxu3 }
 0x7b5   : > { %v3078_v18 = vadd.f32 %v3077_v16, %v3065_v15 }
 0x7b6   : > { %v3092_v19 = vpop.f32.mrf.mxu0 }
 0x7b7   : > { %v3091_v20 = vadd.f32 %v3090_v13, %v3078_v18 }
 0x7b9   : > { %v3066_v21 = vpop.f32.mrf.mxu2 }
 0x7bc   : > { %v3079_v23 = vpop.f32.mrf.mxu3 }
 0x7cf   : > { %v3103_v22 = vpop.f32.mrf.mxu1 }
 0x7d0   : > { %v3104_v27 = vadd.f32 %v3103_v22, %v3091_v20 }
 0x7d2   : > { %v3142_v24 = vpop.f32.mrf.mxu0 }
 0x7d7   : > { %v3105_v25 = vpop.f32.mrf.mxu1 }
 0x7da   : > { %v3144_v26 = vpop.f32.mrf.mxu0 }
 0x7db   : > { %v3116_v28 = vpop.f32.mrf.mxu2 }
 0x7dc   : > { %v3117_v29 = vadd.f32 %v3116_v28, %v3104_v27 }
 0x7de   : > { %v3129_v49 = vpop.f32.mrf.mxu3 }
 0x7df   : > { %v3130_v30 = vadd.f32 %v3129_v49, %v3117_v29 }
 0x7e1   : > { %v3143_v31 = vadd.f32 %v3142_v24, %v3130_v30 }
 0x7e3   : > { %v3118_v32 = vpop.f32.mrf.mxu2 }
 0x7e6   : > { %v3131_v8 = vpop.f32.mrf.mxu3 }
 0x80f   : > { %v3155_v33 = vpop.f32.mrf.mxu1 }
 0x810   : > { %v3156_v37 = vadd.f32 %v3155_v33, %v3143_v31 }
 0x812   : > { %v3194_v34 = vpop.f32.mrf.mxu0 }
 0x817   : > { %v3157_v35 = vpop.f32.mrf.mxu1 }
 0x81a   : > { %v3196_v36 = vpop.f32.mrf.mxu0 }
 0x81b   : > { %v3168_v39 = vpop.f32.mrf.mxu2 }
 0x81c   : > { %v3169_v40 = vadd.f32 %v3168_v39, %v3156_v37 }
 0x81e   : > { %v3181_v41 = vpop.f32.mrf.mxu3 }
 0x81f   : > { %v3182_v38 = vadd.f32 %v3181_v41, %v3169_v40 }
 0x821   : > { %v3195_v42 = vadd.f32 %v3194_v34, %v3182_v38 }
 0x823   : > { %v3198_v43 = vadd.f32 %v3195_v42, %v5168_v46  ;;  %v3170_v44 = vpop.f32.mrf.mxu2 }
 0x825   : > { %v3201_v47 = vsel %vm849_vm2, %v3198_v43, 0.0 }
 0x826   : > { %v3183_v45 = vpop.f32.mrf.mxu3  ;;  %3202 = vadd.xlane.f32.xlu0 %v3201_v47 }
 0x899   : > { %v3203_v48 = vpop.xlane.xlu0 %3202 }
 0x89a   : > { %v3204_v51 = vmul.f32 %v3203_v48, %v5046_v50 }
 0x89c   : > { %v3205_v52 = vsub.f32 %v3198_v43, %v3204_v51 }
 0x89e   : > { %v3206_v57 = vmul.f32 %v3205_v52, %v3205_v52 }
 0x8a0   : > { %v3207_v53 = vsel %vm849_vm2, %v3206_v57, 0.0 }
 0x8a1   : > { %3208 = vadd.xlane.f32.xlu2 %v3207_v53 }
 0x914   : > { %v3209_v54 = vpop.xlane.xlu2 %3208 }
 0x915   : > { %v3210_v55 = vmul.f32 %v3209_v54, %v5046_v50  ;;  %v4577_v50 = vld [vmem:[%s750_s3] ss:$0 sm:$0xff] }
 0x917   : > { %v3211_v56 = vadd.f32 1e-05, %v3210_v55 }
 0x919   : > { %4598 = vrsqrt.f32 %v3211_v56  ;;  %vm3218_vm12 = vweird.f32 %v3211_v56 }
 0x91f   : > { %v4599_v46 = vpop.eup %4598 }
 0x920   : > { %v3213_v58 = vmul.f32 %v4599_v46, %v3211_v56  ;;  %vm3219_vm11 = vweird.f32 %v4599_v46 }
 0x921   : > { %vm3220_vm13 = vmor %vm3218_vm12, %vm3219_vm11 }
 0x922   : > { %v3214_v59 = vmul.f32 %v4599_v46, %v3213_v58 }
 0x924   : > { %v3215_v60 = vmul.f32 0.5, %v3214_v59 }
 0x926   : > { %v3216_v61 = vsub.f32 1.5, %v3215_v60 }
 0x928   : > { %v3217_v62 = vmul.f32 %v4599_v46, %v3216_v61 }
 0x92a   : > { %v3221_v0 = vsel %vm3220_vm13, %v4599_v46, %v3217_v62 }
 0x92b   : > { %v3222_v1 = vmul.f32 %v3221_v0, %v3205_v52 }
 0x92d   : > { %v3226_v2 = vmul.f32 %v4576_v63, %v3222_v1  ;;  %3235 = sbr.rel (%p4270_p1) target bundleno = 2553 (0x9f9), region = 96 }
 0x92f   : > { %v3230_v3 = vadd.f32 %v4577_v50, %v3226_v2 }
 0x931   : > { %3231 = vst.msk [vmem:[#allocation2] sm:$0xff] %vm849_vm2, %v3230_v3 }
 0x932   : > { %v4488_v4 = vld [vmem:[%s5593_s11 + $0x38] sm:$0xff]  ;;  %v4487_v6 = vld [vmem:[%s5593_s11 + $0x30] sm:$0xff]  ;;  %v4486_v9 = vld [vmem:[%s5593_s11 + $0x28] sm:$0xff]  ;;  %v3252_v21 = vpack.c.bf16 %v3230_v3, %v3230_v3 }
 0x933   : > { %v3322_v5 = vsel %vm849_vm2, %v4488_v4, 0  ;;  %v3319_v7 = vsel %vm849_vm2, %v4487_v6, 0  ;;  %v3316_v10 = vsel %vm849_vm2, %v4486_v9, 0  ;;  %v4485_v11 = vld [vmem:[%s5593_s11 + $0x20] sm:$0xff]  ;;  %v4484_v13 = vld [vmem:[%s5593_s11 + $0x18] sm:$0xff]  ;;  %v4483_v15 = vld [vmem:[%s5593_s11 + $0x10] sm:$0xff] }
 0x934   : > { %3324 = vmatpush.bf16.xpose.msra.mxu0 %v3322_v5  ;;  %v3313_v12 = vsel %vm849_vm2, %v4485_v11, 0  ;;  %v3310_v14 = vsel %vm849_vm2, %v4484_v13, 0  ;;  %v3307_v16 = vsel %vm849_vm2, %v4483_v15, 0  ;;  %v4482_v17 = vld [vmem:[%s5593_s11 + $0x8] sm:$0xff]  ;;  %v4481_v19 = vld [vmem:[%s5593_s11] sm:$0xff] }
 0x935   : > { %v3304_v18 = vsel %vm849_vm2, %v4482_v17, 0  ;;  %v3301_v20 = vsel %vm849_vm2, %v4481_v19, 0  ;;  %v4600_v23 = vld [vmem:[%s5594_s18] ss:$0 sm:$0xff] }
 0x93c   : > { %3325 = vmatpush.bf16.xpose.msra.mxu0 %v3319_v7 }
 0x944   : > { %3326 = vmatpush.bf16.xpose.msra.mxu0 %v3316_v10 }
 0x94c   : > { %3327 = vmatpush.bf16.xpose.msra.mxu0 %v3313_v12 }
 0x954   : > { %3328 = vmatpush.bf16.xpose.msra.mxu0 %v3310_v14 }
 0x95c   : > { %3329 = vmatpush.bf16.xpose.msra.mxu0 %v3307_v16 }
 0x964   : > { %3330 = vmatpush.bf16.xpose.msra.mxu0 %v3304_v18 }
 0x96c   : > { %3331 = vmatpush.bf16.xpose.msra.mxu0 %v3301_v20 }
 0x973   : > { %4303 = vmatmul.msk.bf16.vlgmr.msra.gmra.mxu0 %vm849_vm2, %v3252_v21 }
 0x9f0   : > { %v3333_v22 = vpop.f32.mrf.mxu0 }
 0x9f1   : > { %v3334_v24 = vadd.f32 %v4600_v23, %v3333_v22 }
 0x9f3   : > { %3337 = vst [vmem:[%s701_s21] sm:$0xff] %v3334_v24 }
 0x9f8   : > { %v3335_v25 = vpop.f32.mrf.mxu0 }
 0x9f9 PF: > { %s5595_s2 = sld [smem:[#allocation10_spill]]  ;;  %s3351_s4 = sshll.u32 %s701_s21, 4  ;;  %s3352_s4 = int_to_ptr.vmem [resolvable:$true] %s3351_s4 }
 0x9fa   : > { %s5596_s30 = sld [smem:[#allocation7_spill]] }
 0x9fb   : > { %s5598_s28 = sld [smem:[#allocation28_spill]] }
 0x9ff   : > { %s4305_s19 = sshll.u32 %s5595_s2, 3 }
 0xa00   : > { %s5600_s5 = sand.u32 1, %s5596_s30  }
 0xa01   : > { %s5599_s1 = smov %s5598_s28  ;;  %s3349_s22 = scalar_lea.hbm %s5598_s28, %s4305_s19 }
 0xa02   : > { %s3353_s23 = sshll.u32 %s3349_s22, 4  ;;  %s3339_s7 = scalar_lea.sflag [#allocation4], %s5600_s5  ;;  %s3354_s23 = int_to_ptr.hbm [resolvable:$true] %s3353_s23 }
 0xa03   : > { %s4615_s17 = sshra.s32 %s3354_s23, 4  ;;  %s4621_s6 = scalar_lea.hbm %s5599_s1, 16  ;;  %s4616_s17 = int_to_ptr.hbm [resolvable:$true] %s4615_s17 }
 0xa04   : > { %s4617_s0 = scalar_lea.hbm %s4616_s17, 8  ;;  %p4622_p6 = scmp.lt.s32.totalorder %s4616_s17, %s5599_s1 }
 0xa05   : > { %p4618_p2 = scmp.ne.s32.totalorder %s4616_s17, %s4617_s0  ;;  %p4623_p7 = scmp.lt.s32.totalorder %s4621_s6, %s4617_s0 }
 0xa07   : > { %p4619_p4 = pnand %p4618_p2, %p4845_p3  ;;  %p4624_p8 = por %p4623_p7, %p4622_p6 }
 0xa09   : > { %p4620_p5 = pneg %p4619_p4 }
 0xa0b   : > { %p4625_p10 = pnand %p4624_p8, %p4620_p5 }
 0xa0d   : > { %4628 = shalt.err (!%p4625_p10)
}
 0xa0e   : > { %4490 = dma.vmem_to_hbm [thread:$0]  (%p4845_p3), %s3352_s4, 128, %s3354_s23, %s3339_s7  }
 0xa0f PF: > { %s5601_s29 = sld [smem:[#allocation13_spill]] }
 0xa10   : > { %s5602_s21 = sld [smem:[#allocation6_spill]] }
 0xa15   : > { %p4496_p11 = scmp.ge.s32.totalorder %s5601_s29, 2 }
 0xa16   : > { %s3365_s19 = sand.u32 1, %s5602_s21  }
 0xa17   : > { %p4493_p12 = pnand %p4496_p11, %p4855_p9  ;;  %s3366_s24 = scalar_lea.sflag [#allocation4], %s3365_s19 }
 0xa19   : > { %p4494_p13 = pneg %p4493_p12 }
 0xa1b   : > { %4662 = dma.done.wait (%p4494_p13), %s3366_s24, 128  }
 0xa1c   : > { %4664 = vsyncadd (%p4494_p13), %s3366_s24, 4294967168  ;;  %s30_s30 = sadd.s32 1, %s5601_s29   ;;  %s5604_s24 = sld [smem:[#allocation7_spill]] }
 0xa1d   : > { %p27_p0 = scmp.ge.s32.totalorder %s30_s30, 6   ;;  %s5605_s25 = sld [smem:[#allocation8_spill]] }
 0xa1e   : > { %s5606_s26 = sld [smem:[#allocation18_spill]] }
 0xa1f   : > { %s5607_s3 = sld [smem:[#allocation11_spill]] }
 0xa20   : > { %s5608_s28 = sld [smem:[#allocation12_spill]] }
 0xa21   : > { %s5609_s29 = sld [smem:[#allocation14_spill]]  ;;  %29 = sbr.rel (!%p27_p0) target bundleno = 17 (0x11), region = 167 }
 0xa22   : > { %s5610_s0 = sld [smem:[#allocation16_spill]] }
 0xa25   : > { %5611 = sst [smem:[#allocation6_spill]] %s5607_s3 }
 0xa26   :  { %3372 = vsyncpa [#allocation4], 1 }
 0xa27   :  { %3374 = vsyncpa [#allocation4 + $0x1], 1 }

</bundles_post_ra>
